<compile_context>
chip_gen: v5e
topology: v5e:2x2
jax: 0.10.0
libtpu: 0.0.40
codegen_flags: <defaults>
</compile_context>

<pallas_src>
import jax
import jax.numpy as jnp
from jax.experimental import pallas as pl
from jax.experimental.pallas import tpu as pltpu

KH = KW = 5  # conv kernel size (both conv layers)


# ----------------------------------------------------------------------------
# Pallas kernels
# ----------------------------------------------------------------------------
def _conv1_pool_kernel(p_ref, w_ref, b_ref, o_ref):
    """conv1 (im2col matmul) + bias + ReLU + 2x2 maxpool for one image.

    p_ref: (1, 800, 128) bf16  rows = pool_pos*200 + (ph*14+pw), K=(dy,dx,c)
    w_ref: (128, 128)    bf16  conv1 weights (75x6 valid), rows (dy,dx,c)
    b_ref: (1, 128)      f32   bias (6 valid)
    o_ref: (1, 200, 128) bf16  pooled activations, rows (ph*14+pw), lanes=ch
    """
    z = jnp.dot(p_ref[0], w_ref[...], preferred_element_type=jnp.float32)
    m = jnp.maximum(jnp.maximum(z[0:200], z[200:400]),
                    jnp.maximum(z[400:600], z[600:800]))
    o_ref[0] = jnp.maximum(m + b_ref[...], 0.0).astype(o_ref.dtype)


def _tail_kernel(p_ref, w2_ref, b2_ref, wf1_ref, bf1_ref, wf2_ref, bf2_ref,
                 o_ref, a2_scr, flat_scr):
    """conv2+bias+ReLU+pool + flatten + fc1+ReLU + fc2+ReLU for one image.

    p_ref: (1, 128, 256) bf16  rows = pool_pos*32 + (ph*5+pw), K=(dy,dx,c)
    w2_ref : (256, 128) bf16   conv2 weights (150x16 valid)
    wf1_ref: (512, 128) bf16   fc1 weights, rows ordered (ph,pw,c) (400x120)
    wf2_ref: (128, 128) bf16   fc2 weights (120x84 valid)
    o_ref  : (1, 8, 128) f32   row 0, lanes 0:84 hold the result
    a2_scr : (32, 128)  f32 VMEM scratch (pooled conv2 activations)
    flat_scr:(8, 512)   f32 VMEM scratch (flattened 400-feature fc1 input)
    """
    # conv2 for all 4 pool-window positions in one MXU pass, then fused pool.
    z = jnp.dot(p_ref[0], w2_ref[...], preferred_element_type=jnp.float32)
    m = jnp.maximum(jnp.maximum(z[0:32], z[32:64]),
                    jnp.maximum(z[64:96], z[96:128]))
    a2_scr[...] = jnp.maximum(m + b2_ref[...], 0.0)          # (32,128) f32

    # Flatten 25 rows x 16 channels -> 400 lanes of row 0, order (ph, pw, c).
    flat_scr[...] = jnp.zeros_like(flat_scr)                 # NaN-safe padding
    for r in range(25):
        flat_scr[0:1, 16 * r:16 * r + 16] = a2_scr[r:r + 1, 0:16]

    # fc1 + ReLU, fc2 + ReLU (M=8, only row 0 is meaningful).
    h = jnp.dot(flat_scr[...].astype(jnp.bfloat16), wf1_ref[...],
                preferred_element_type=jnp.float32)
    h = jnp.maximum(h + bf1_ref[...], 0.0)
    y = jnp.dot(h.astype(jnp.bfloat16), wf2_ref[...],
                preferred_element_type=jnp.float32)
    o_ref[0] = jnp.maximum(y + bf2_ref[...], 0.0).astype(o_ref.dtype)


# ----------------------------------------------------------------------------
# Pallas wrappers (grid over batch, "parallel" for v7x megacore)
# ----------------------------------------------------------------------------
def _conv1_call(p1, w1, b1):
    n = p1.shape[0]
    return pl.pallas_call(
        _conv1_pool_kernel,
        out_shape=jax.ShapeDtypeStruct((n, 200, 128), jnp.bfloat16),
        grid=(n,),
        in_specs=[
            pl.BlockSpec((1, 800, 128), lambda i: (i, 0, 0)),
            pl.BlockSpec((128, 128), lambda i: (0, 0)),
            pl.BlockSpec((1, 128), lambda i: (0, 0)),
        ],
        out_specs=pl.BlockSpec((1, 200, 128), lambda i: (i, 0, 0)),
        compiler_params=pltpu.CompilerParams(
            dimension_semantics=("parallel",)),
    )(p1, w1, b1)


def _tail_call(p2, w2, b2, wf1, bf1, wf2, bf2):
    n = p2.shape[0]
    return pl.pallas_call(
        _tail_kernel,
        out_shape=jax.ShapeDtypeStruct((n, 8, 128), jnp.float32),
        grid=(n,),
        in_specs=[
            pl.BlockSpec((1, 128, 256), lambda i: (i, 0, 0)),
            pl.BlockSpec((256, 128), lambda i: (0, 0)),
            pl.BlockSpec((1, 128), lambda i: (0, 0)),
            pl.BlockSpec((512, 128), lambda i: (0, 0)),
            pl.BlockSpec((1, 128), lambda i: (0, 0)),
            pl.BlockSpec((128, 128), lambda i: (0, 0)),
            pl.BlockSpec((1, 128), lambda i: (0, 0)),
        ],
        out_specs=pl.BlockSpec((1, 8, 128), lambda i: (i, 0, 0)),
        scratch_shapes=[
            pltpu.VMEM((32, 128), jnp.float32),
            pltpu.VMEM((8, 512), jnp.float32),
        ],
        compiler_params=pltpu.CompilerParams(
            dimension_semantics=("parallel",)),
    )(p2, w2, b2, wf1, bf1, wf2, bf2)


# ----------------------------------------------------------------------------
# XLA glue: pool-ordered im2col patches via strided views (no big transpose)
# ----------------------------------------------------------------------------
def _conv_pool_patches(a, pool):
    """a: (N,H,W,C) -> (N, pool*pool, PH*PW, KH*KW*C) patches for a valid 5x5
    conv followed by (pool,pool) max pooling.  The pool-position axis is built
    leading from strided ::pool slices of the (small) input, so no large
    patch-tensor transpose is ever materialized."""
    n, h, w, c = a.shape
    oh, ow = h - KH + 1, w - KW + 1
    assert oh % pool == 0 and ow % pool == 0, "cifar variant only (32x32 in)"
    ph, pw = oh // pool, ow // pool
    per_pos = []
    for ay in range(pool):
        for bx in range(pool):
            taps = []
            for dy in range(KH):
                for dx in range(KW):
                    ys, xs = ay + dy, bx + dx
                    taps.append(a[:, ys:ys + pool * (ph - 1) + 1:pool,
                                  xs:xs + pool * (pw - 1) + 1:pool, :])
            t = jnp.stack(taps, axis=3)                     # (n,ph,pw,25,c)
            per_pos.append(t.reshape(n, ph * pw, KH * KW * c))
    return jnp.stack(per_pos, axis=1)                       # (n,4,ph*pw,25*c)


def _pad_and_flatten(p, rows_to, k_to):
    """(n,4,rows,k) -> zero-pad to (n,4,rows_to,k_to) -> (n,4*rows_to,k_to)."""
    n, npos, rows, k = p.shape
    p = jnp.pad(p, ((0, 0), (0, 0), (0, rows_to - rows), (0, k_to - k)))
    return p.reshape(n, npos * rows_to, k_to)


# ----------------------------------------------------------------------------
# Net1 ('cifar') parameters + one-time weight preparation + forward
# ----------------------------------------------------------------------------
def init_params(key):
    def uinit(k, shape, fan_in):
        bound = 1.0 / jnp.sqrt(float(fan_in))
        return jax.random.uniform(k, shape, jnp.float32, -bound, bound)

    ks = jax.random.split(key, 8)
    return {
        "conv1_w": uinit(ks[0], (6, 3, 5, 5), 3 * 5 * 5),
        "conv1_b": uinit(ks[1], (6,), 3 * 5 * 5),
        "conv2_w": uinit(ks[2], (16, 6, 5, 5), 6 * 5 * 5),
        "conv2_b": uinit(ks[3], (16,), 6 * 5 * 5),
        "fc1_w": uinit(ks[4], (120, 16 * 5 * 5), 16 * 5 * 5),
        "fc1_b": uinit(ks[5], (120,), 16 * 5 * 5),
        "fc2_w": uinit(ks[6], (84, 120), 120),
        "fc2_b": uinit(ks[7], (84,), 120),
    }


def prepare_params(params):
    """One-time weight re-layout, bf16 cast and zero padding."""
    bf, f32 = jnp.bfloat16, jnp.float32
    # conv1: OIHW (6,3,5,5) -> rows (dy,dx,c) -> (75,6) -> pad (128,128)
    w1 = jnp.transpose(params["conv1_w"], (2, 3, 1, 0)).reshape(75, 6)
    w1 = jnp.pad(w1, ((0, 53), (0, 122))).astype(bf)
    b1 = jnp.pad(params["conv1_b"], (0, 122)).reshape(1, 128).astype(f32)
    # conv2: (16,6,5,5) -> (150,16) -> pad (256,128)
    w2 = jnp.transpose(params["conv2_w"], (2, 3, 1, 0)).reshape(150, 16)
    w2 = jnp.pad(w2, ((0, 106), (0, 112))).astype(bf)
    b2 = jnp.pad(params["conv2_b"], (0, 112)).reshape(1, 128).astype(f32)
    # fc1: torch rows are (c,i,j); our in-kernel flatten is (i,j,c) -> permute.
    wf1 = params["fc1_w"].reshape(120, 16, 5, 5).transpose(2, 3, 1, 0)
    wf1 = wf1.reshape(400, 120)
    wf1 = jnp.pad(wf1, ((0, 112), (0, 8))).astype(bf)
    bf1 = jnp.pad(params["fc1_b"], (0, 8)).reshape(1, 128).astype(f32)
    # fc2: (84,120) -> transpose -> pad (128,128)
    wf2 = jnp.pad(params["fc2_w"].T, ((0, 8), (0, 44))).astype(bf)
    bf2 = jnp.pad(params["fc2_b"], (0, 44)).reshape(1, 128).astype(f32)
    return {"w1": w1, "b1": b1, "w2": w2, "b2": b2,
            "wf1": wf1, "bf1": bf1, "wf2": wf2, "bf2": bf2}


def net1_forward(prep, x):
    """x: (N, 3, 32, 32) float32 -> (N, 84) float32 (cifar variant)."""
    n = x.shape[0]
    a0 = jnp.transpose(x, (0, 2, 3, 1)).astype(jnp.bfloat16)   # (n,32,32,3)

    # Layer 1: conv1 + ReLU + maxpool(2,2), one image per grid step.
    p1 = _pad_and_flatten(_conv_pool_patches(a0, 2), 200, 128)  # (n,800,128)
    a1 = _conv1_call(p1, prep["w1"], prep["b1"])                # (n,200,128)
    a1 = a1[:, :196, :6].reshape(n, 14, 14, 6)                  # bf16, ~9 KB

    # Layer 2 + fc head, fully fused in one kernel per image.
    p2 = _pad_and_flatten(_conv_pool_patches(a1, 2), 32, 256)   # (n,128,256)
    out = _tail_call(p2, prep["w2"], prep["b2"], prep["wf1"], prep["bf1"],
                     prep["wf2"], prep["bf2"])                  # (n,8,128)
    return out[:, 0, :84]


# ----------------------------------------------------------------------------
# Pure-JAX f32 reference (for correctness check only)
# ----------------------------------------------------------------------------
def net1_reference(params, x):
    def conv(x, w, b):
        y = jax.lax.conv_general_dilated(
            x, w, window_strides=(1, 1), padding="VALID",
            dimension_numbers=("NCHW", "OIHW", "NCHW"))
        return jax.nn.relu(y + b[None, :, None, None])

    def pool(x, p):
        return jax.lax.reduce_window(
            x, -jnp.inf, jax.lax.max, (1, 1, p, p), (1, 1, p, p), "VALID")

    x = pool(conv(x, params["conv1_w"], params["conv1_b"]), 2)
    x = pool(conv(x, params["conv2_w"], params["conv2_b"]), 2)
    x = x.reshape(-1, 16 * 5 * 5)
    x = jax.nn.relu(x @ params["fc1_w"].T + params["fc1_b"])
    x = jax.nn.relu(x @ params["fc2_w"].T + params["fc2_b"])
    return x


if __name__ == "__main__":
    key = jax.random.PRNGKey(0)
    pkey, xkey = jax.random.split(key)
    params = init_params(pkey)
    prep = prepare_params(params)          # one-time weight re-layout

    # cifar-style input: batch=2, NCHW
    x = jax.random.normal(xkey, (2, 3, 32, 32), jnp.float32)

    fwd = jax.jit(net1_forward)
    out = jax.block_until_ready(fwd(prep, x))

    ref = net1_reference(params, x)
    assert out.shape == (2, 84), out.shape
    # bf16 MXU operands with f32 accumulation: allow ~1e-2 numerical slack
    # (structural/layout bugs would show up as O(0.1-1) mismatches).
    max_err = float(jnp.max(jnp.abs(out - ref)))
    assert jnp.allclose(out, ref, atol=3e-2, rtol=3e-2), (
        f"mismatch vs reference: max abs err = {max_err}")

    print("KERNEL_OK")
</pallas_src>

<mosaic_0001>
module attributes {stable_mosaic.version = 11 : i64} {
  func.func @_conv1_pool_kernel(%arg0: i32, %arg1: memref<1x800x128xbf16, #tpu.memory_space<vmem>>, %arg2: memref<128x128xbf16, #tpu.memory_space<vmem>>, %arg3: memref<1x128xf32, #tpu.memory_space<vmem>>, %arg4: memref<1x200x128xbf16, #tpu.memory_space<vmem>>) attributes {dimension_semantics = [#tpu.dimension_semantics<parallel>], iteration_bounds = array<i64: 2>, scalar_prefetch = 0 : i64, scratch_operands = 0 : i64, tpu.core_type = #tpu.core_type<tc>, window_params = [{transform_indices = @transform_0, window_bounds = array<i64: 1, 800, 128>}, {pipeline_mode = #tpu.pipeline_mode<synchronous>, transform_indices = @transform_1, window_bounds = array<i64: 128, 128>}, {pipeline_mode = #tpu.pipeline_mode<synchronous>, transform_indices = @transform_2, window_bounds = array<i64: 1, 128>}, {transform_indices = @transform_3, window_bounds = array<i64: 1, 200, 128>}]} {
    %c0 = arith.constant 0 : index
    %c0_0 = arith.constant 0 : index
    %c0_1 = arith.constant 0 : index
    %0 = vector.load %arg1[%c0, %c0_0, %c0_1] : memref<1x800x128xbf16, #tpu.memory_space<vmem>>, vector<1x800x128xbf16>
    %1 = vector.shape_cast %0 : vector<1x800x128xbf16> to vector<800x128xbf16>
    %c0_2 = arith.constant 0 : index
    %c0_3 = arith.constant 0 : index
    %2 = vector.load %arg2[%c0_2, %c0_3] : memref<128x128xbf16, #tpu.memory_space<vmem>>, vector<128x128xbf16>
    %cst = arith.constant dense<0.000000e+00> : vector<800x128xf32>
    %3 = tpu.matmul %1, %2, %cst {dimension_numbers = #tpu.dot_dimension_numbers<[1], [0], [0], [1], [0, 0, 1, 1], [], []>} : vector<800x128xbf16>, vector<128x128xbf16>, vector<800x128xf32> -> vector<800x128xf32>
    %4 = vector.extract_strided_slice %3 {offsets = [0, 0], sizes = [200, 128], strides = [1, 1]} : vector<800x128xf32> to vector<200x128xf32>
    %5 = vector.extract_strided_slice %3 {offsets = [200, 0], sizes = [200, 128], strides = [1, 1]} : vector<800x128xf32> to vector<200x128xf32>
    %6 = arith.maximumf %4, %5 : vector<200x128xf32>
    %7 = vector.extract_strided_slice %3 {offsets = [400, 0], sizes = [200, 128], strides = [1, 1]} : vector<800x128xf32> to vector<200x128xf32>
    %8 = vector.extract_strided_slice %3 {offsets = [600, 0], sizes = [200, 128], strides = [1, 1]} : vector<800x128xf32> to vector<200x128xf32>
    %9 = arith.maximumf %7, %8 : vector<200x128xf32>
    %10 = arith.maximumf %6, %9 : vector<200x128xf32>
    %c0_4 = arith.constant 0 : index
    %c0_5 = arith.constant 0 : index
    %11 = vector.load %arg3[%c0_4, %c0_5] : memref<1x128xf32, #tpu.memory_space<vmem>>, vector<1x128xf32>
    %12 = vector.broadcast %11 : vector<1x128xf32> to vector<200x128xf32>
    %13 = arith.addf %10, %12 : vector<200x128xf32>
    %cst_6 = arith.constant 0.000000e+00 : f32
    %14 = vector.broadcast %cst_6 : f32 to vector<200x128xf32>
    %15 = arith.maximumf %13, %14 : vector<200x128xf32>
    %16 = arith.truncf %15 : vector<200x128xf32> to vector<200x128xbf16>
    %c0_7 = arith.constant 0 : index
    %c0_8 = arith.constant 0 : index
    %c0_9 = arith.constant 0 : index
    %17 = vector.load %arg4[%c0_7, %c0_8, %c0_9] : memref<1x200x128xbf16, #tpu.memory_space<vmem>>, vector<1x200x128xbf16>
    %18 = vector.shape_cast %17 : vector<1x200x128xbf16> to vector<200x128xbf16>
    %19 = vector.shape_cast %16 : vector<200x128xbf16> to vector<1x200x128xbf16>
    tpu.vector_store %arg4[%c0_7, %c0_8, %c0_9], %19 {strides = array<i32>} : memref<1x200x128xbf16, #tpu.memory_space<vmem>>, vector<1x200x128xbf16>,
    return
  }
  func.func @transform_0(%arg0: i32) -> (i32, i32, i32) {
    %c0_i32 = arith.constant 0 : i32
    %c0_i32_0 = arith.constant 0 : i32
    %c0_i32_1 = arith.constant 0 : i32
    return %arg0, %c0_i32, %c0_i32_0 : i32, i32, i32
  }
  func.func @transform_1(%arg0: i32) -> (i32, i32) {
    %c0_i32 = arith.constant 0 : i32
    %c0_i32_0 = arith.constant 0 : i32
    %c0_i32_1 = arith.constant 0 : i32
    return %c0_i32, %c0_i32_0 : i32, i32
  }
  func.func @transform_2(%arg0: i32) -> (i32, i32) {
    %c0_i32 = arith.constant 0 : i32
    %c0_i32_0 = arith.constant 0 : i32
    %c0_i32_1 = arith.constant 0 : i32
    return %c0_i32, %c0_i32_0 : i32, i32
  }
  func.func @transform_3(%arg0: i32) -> (i32, i32, i32) {
    %c0_i32 = arith.constant 0 : i32
    %c0_i32_0 = arith.constant 0 : i32
    %c0_i32_1 = arith.constant 0 : i32
    return %arg0, %c0_i32, %c0_i32_0 : i32, i32, i32
  }
}

module attributes {stable_mosaic.version = 11 : i64} {
  func.func @_tail_kernel(%arg0: i32, %arg1: memref<1x128x256xbf16, #tpu.memory_space<vmem>>, %arg2: memref<256x128xbf16, #tpu.memory_space<vmem>>, %arg3: memref<1x128xf32, #tpu.memory_space<vmem>>, %arg4: memref<512x128xbf16, #tpu.memory_space<vmem>>, %arg5: memref<1x128xf32, #tpu.memory_space<vmem>>, %arg6: memref<128x128xbf16, #tpu.memory_space<vmem>>, %arg7: memref<1x128xf32, #tpu.memory_space<vmem>>, %arg8: memref<1x8x128xf32, #tpu.memory_space<vmem>>, %arg9: memref<32x128xf32, #tpu.memory_space<vmem>>, %arg10: memref<8x512xf32, #tpu.memory_space<vmem>>) attributes {dimension_semantics = [#tpu.dimension_semantics<parallel>], iteration_bounds = array<i64: 2>, scalar_prefetch = 0 : i64, scratch_operands = 2 : i64, tpu.core_type = #tpu.core_type<tc>, window_params = [{transform_indices = @transform_0, window_bounds = array<i64: 1, 128, 256>}, {pipeline_mode = #tpu.pipeline_mode<synchronous>, transform_indices = @transform_1, window_bounds = array<i64: 256, 128>}, {pipeline_mode = #tpu.pipeline_mode<synchronous>, transform_indices = @transform_2, window_bounds = array<i64: 1, 128>}, {pipeline_mode = #tpu.pipeline_mode<synchronous>, transform_indices = @transform_3, window_bounds = array<i64: 512, 128>}, {pipeline_mode = #tpu.pipeline_mode<synchronous>, transform_indices = @transform_4, window_bounds = array<i64: 1, 128>}, {pipeline_mode = #tpu.pipeline_mode<synchronous>, transform_indices = @transform_5, window_bounds = array<i64: 128, 128>}, {pipeline_mode = #tpu.pipeline_mode<synchronous>, transform_indices = @transform_6, window_bounds = array<i64: 1, 128>}, {transform_indices = @transform_7, window_bounds = array<i64: 1, 8, 128>}]} {
    %c0 = arith.constant 0 : index
    %c0_0 = arith.constant 0 : index
    %c0_1 = arith.constant 0 : index
    %0 = vector.load %arg1[%c0, %c0_0, %c0_1] : memref<1x128x256xbf16, #tpu.memory_space<vmem>>, vector<1x128x256xbf16>
    %1 = vector.shape_cast %0 : vector<1x128x256xbf16> to vector<128x256xbf16>
    %c0_2 = arith.constant 0 : index
    %c0_3 = arith.constant 0 : index
    %2 = vector.load %arg2[%c0_2, %c0_3] : memref<256x128xbf16, #tpu.memory_space<vmem>>, vector<256x128xbf16>
    %cst = arith.constant dense<0.000000e+00> : vector<128x128xf32>
    %3 = tpu.matmul %1, %2, %cst {dimension_numbers = #tpu.dot_dimension_numbers<[1], [0], [0], [1], [0, 0, 1, 1], [], []>} : vector<128x256xbf16>, vector<256x128xbf16>, vector<128x128xf32> -> vector<128x128xf32>
    %4 = vector.extract_strided_slice %3 {offsets = [0, 0], sizes = [32, 128], strides = [1, 1]} : vector<128x128xf32> to vector<32x128xf32>
    %5 = vector.extract_strided_slice %3 {offsets = [32, 0], sizes = [32, 128], strides = [1, 1]} : vector<128x128xf32> to vector<32x128xf32>
    %6 = arith.maximumf %4, %5 : vector<32x128xf32>
    %7 = vector.extract_strided_slice %3 {offsets = [64, 0], sizes = [32, 128], strides = [1, 1]} : vector<128x128xf32> to vector<32x128xf32>
    %8 = vector.extract_strided_slice %3 {offsets = [96, 0], sizes = [32, 128], strides = [1, 1]} : vector<128x128xf32> to vector<32x128xf32>
    %9 = arith.maximumf %7, %8 : vector<32x128xf32>
    %10 = arith.maximumf %6, %9 : vector<32x128xf32>
    %c0_4 = arith.constant 0 : index
    %c0_5 = arith.constant 0 : index
    %11 = vector.load %arg3[%c0_4, %c0_5] : memref<1x128xf32, #tpu.memory_space<vmem>>, vector<1x128xf32>
    %12 = vector.broadcast %11 : vector<1x128xf32> to vector<32x128xf32>
    %13 = arith.addf %10, %12 : vector<32x128xf32>
    %cst_6 = arith.constant 0.000000e+00 : f32
    %14 = vector.broadcast %cst_6 : f32 to vector<32x128xf32>
    %15 = arith.maximumf %13, %14 : vector<32x128xf32>
    %c0_7 = arith.constant 0 : index
    %c0_8 = arith.constant 0 : index
    %16 = vector.load %arg9[%c0_7, %c0_8] : memref<32x128xf32, #tpu.memory_space<vmem>>, vector<32x128xf32>
    tpu.vector_store %arg9[%c0_7, %c0_8], %15 {strides = array<i32>} : memref<32x128xf32, #tpu.memory_space<vmem>>, vector<32x128xf32>,
    %cst_9 = arith.constant 0.000000e+00 : f32
    %17 = vector.broadcast %cst_9 : f32 to vector<8x512xf32>
    %c0_10 = arith.constant 0 : index
    %c0_11 = arith.constant 0 : index
    %18 = vector.load %arg10[%c0_10, %c0_11] : memref<8x512xf32, #tpu.memory_space<vmem>>, vector<8x512xf32>
    tpu.vector_store %arg10[%c0_10, %c0_11], %17 {strides = array<i32>} : memref<8x512xf32, #tpu.memory_space<vmem>>, vector<8x512xf32>,
    %c0_12 = arith.constant 0 : index
    %c0_13 = arith.constant 0 : index
    %19 = vector.load %arg9[%c0_12, %c0_13] : memref<32x128xf32, #tpu.memory_space<vmem>>, vector<1x16xf32>
    %c0_14 = arith.constant 0 : index
    %c0_15 = arith.constant 0 : index
    %20 = vector.load %arg10[%c0_14, %c0_15] : memref<8x512xf32, #tpu.memory_space<vmem>>, vector<1x16xf32>
    tpu.vector_store %arg10[%c0_14, %c0_15], %19 {strides = array<i32>} : memref<8x512xf32, #tpu.memory_space<vmem>>, vector<1x16xf32>,
    %c1 = arith.constant 1 : index
    %c0_16 = arith.constant 0 : index
    %21 = vector.load %arg9[%c1, %c0_16] : memref<32x128xf32, #tpu.memory_space<vmem>>, vector<1x16xf32>
    %c0_17 = arith.constant 0 : index
    %c16 = arith.constant 16 : index
    %22 = vector.load %arg10[%c0_17, %c16] : memref<8x512xf32, #tpu.memory_space<vmem>>, vector<1x16xf32>
    tpu.vector_store %arg10[%c0_17, %c16], %21 {strides = array<i32>} : memref<8x512xf32, #tpu.memory_space<vmem>>, vector<1x16xf32>,
    %c2 = arith.constant 2 : index
    %c0_18 = arith.constant 0 : index
    %23 = vector.load %arg9[%c2, %c0_18] : memref<32x128xf32, #tpu.memory_space<vmem>>, vector<1x16xf32>
    %c0_19 = arith.constant 0 : index
    %c32 = arith.constant 32 : index
    %24 = vector.load %arg10[%c0_19, %c32] : memref<8x512xf32, #tpu.memory_space<vmem>>, vector<1x16xf32>
    tpu.vector_store %arg10[%c0_19, %c32], %23 {strides = array<i32>} : memref<8x512xf32, #tpu.memory_space<vmem>>, vector<1x16xf32>,
    %c3 = arith.constant 3 : index
    %c0_20 = arith.constant 0 : index
    %25 = vector.load %arg9[%c3, %c0_20] : memref<32x128xf32, #tpu.memory_space<vmem>>, vector<1x16xf32>
    %c0_21 = arith.constant 0 : index
    %c48 = arith.constant 48 : index
    %26 = vector.load %arg10[%c0_21, %c48] : memref<8x512xf32, #tpu.memory_space<vmem>>, vector<1x16xf32>
    tpu.vector_store %arg10[%c0_21, %c48], %25 {strides = array<i32>} : memref<8x512xf32, #tpu.memory_space<vmem>>, vector<1x16xf32>,
    %c4 = arith.constant 4 : index
    %c0_22 = arith.constant 0 : index
    %27 = vector.load %arg9[%c4, %c0_22] : memref<32x128xf32, #tpu.memory_space<vmem>>, vector<1x16xf32>
    %c0_23 = arith.constant 0 : index
    %c64 = arith.constant 64 : index
    %28 = vector.load %arg10[%c0_23, %c64] : memref<8x512xf32, #tpu.memory_space<vmem>>, vector<1x16xf32>
    tpu.vector_store %arg10[%c0_23, %c64], %27 {strides = array<i32>} : memref<8x512xf32, #tpu.memory_space<vmem>>, vector<1x16xf32>,
    %c5 = arith.constant 5 : index
    %c0_24 = arith.constant 0 : index
    %29 = vector.load %arg9[%c5, %c0_24] : memref<32x128xf32, #tpu.memory_space<vmem>>, vector<1x16xf32>
    %c0_25 = arith.constant 0 : index
    %c80 = arith.constant 80 : index
    %30 = vector.load %arg10[%c0_25, %c80] : memref<8x512xf32, #tpu.memory_space<vmem>>, vector<1x16xf32>
    tpu.vector_store %arg10[%c0_25, %c80], %29 {strides = array<i32>} : memref<8x512xf32, #tpu.memory_space<vmem>>, vector<1x16xf32>,
    %c6 = arith.constant 6 : index
    %c0_26 = arith.constant 0 : index
    %31 = vector.load %arg9[%c6, %c0_26] : memref<32x128xf32, #tpu.memory_space<vmem>>, vector<1x16xf32>
    %c0_27 = arith.constant 0 : index
    %c96 = arith.constant 96 : index
    %32 = vector.load %arg10[%c0_27, %c96] : memref<8x512xf32, #tpu.memory_space<vmem>>, vector<1x16xf32>
    tpu.vector_store %arg10[%c0_27, %c96], %31 {strides = array<i32>} : memref<8x512xf32, #tpu.memory_space<vmem>>, vector<1x16xf32>,
    %c7 = arith.constant 7 : index
    %c0_28 = arith.constant 0 : index
    %33 = vector.load %arg9[%c7, %c0_28] : memref<32x128xf32, #tpu.memory_space<vmem>>, vector<1x16xf32>
    %c0_29 = arith.constant 0 : index
    %c112 = arith.constant 112 : index
    %34 = vector.load %arg10[%c0_29, %c112] : memref<8x512xf32, #tpu.memory_space<vmem>>, vector<1x16xf32>
    tpu.vector_store %arg10[%c0_29, %c112], %33 {strides = array<i32>} : memref<8x512xf32, #tpu.memory_space<vmem>>, vector<1x16xf32>,
    %c8 = arith.constant 8 : index
    %c0_30 = arith.constant 0 : index
    %35 = vector.load %arg9[%c8, %c0_30] : memref<32x128xf32, #tpu.memory_space<vmem>>, vector<1x16xf32>
    %c0_31 = arith.constant 0 : index
    %c128 = arith.constant 128 : index
    %36 = vector.load %arg10[%c0_31, %c128] : memref<8x512xf32, #tpu.memory_space<vmem>>, vector<1x16xf32>
    tpu.vector_store %arg10[%c0_31, %c128], %35 {strides = array<i32>} : memref<8x512xf32, #tpu.memory_space<vmem>>, vector<1x16xf32>,
    %c9 = arith.constant 9 : index
    %c0_32 = arith.constant 0 : index
    %37 = vector.load %arg9[%c9, %c0_32] : memref<32x128xf32, #tpu.memory_space<vmem>>, vector<1x16xf32>
    %c0_33 = arith.constant 0 : index
    %c144 = arith.constant 144 : index
    %38 = vector.load %arg10[%c0_33, %c144] : memref<8x512xf32, #tpu.memory_space<vmem>>, vector<1x16xf32>
    tpu.vector_store %arg10[%c0_33, %c144], %37 {strides = array<i32>} : memref<8x512xf32, #tpu.memory_space<vmem>>, vector<1x16xf32>,
    %c10 = arith.constant 10 : index
    %c0_34 = arith.constant 0 : index
    %39 = vector.load %arg9[%c10, %c0_34] : memref<32x128xf32, #tpu.memory_space<vmem>>, vector<1x16xf32>
    %c0_35 = arith.constant 0 : index
    %c160 = arith.constant 160 : index
    %40 = vector.load %arg10[%c0_35, %c160] : memref<8x512xf32, #tpu.memory_space<vmem>>, vector<1x16xf32>
    tpu.vector_store %arg10[%c0_35, %c160], %39 {strides = array<i32>} : memref<8x512xf32, #tpu.memory_space<vmem>>, vector<1x16xf32>,
    %c11 = arith.constant 11 : index
    %c0_36 = arith.constant 0 : index
    %41 = vector.load %arg9[%c11, %c0_36] : memref<32x128xf32, #tpu.memory_space<vmem>>, vector<1x16xf32>
    %c0_37 = arith.constant 0 : index
    %c176 = arith.constant 176 : index
    %42 = vector.load %arg10[%c0_37, %c176] : memref<8x512xf32, #tpu.memory_space<vmem>>, vector<1x16xf32>
    tpu.vector_store %arg10[%c0_37, %c176], %41 {strides = array<i32>} : memref<8x512xf32, #tpu.memory_space<vmem>>, vector<1x16xf32>,
    %c12 = arith.constant 12 : index
    %c0_38 = arith.constant 0 : index
    %43 = vector.load %arg9[%c12, %c0_38] : memref<32x128xf32, #tpu.memory_space<vmem>>, vector<1x16xf32>
    %c0_39 = arith.constant 0 : index
    %c192 = arith.constant 192 : index
    %44 = vector.load %arg10[%c0_39, %c192] : memref<8x512xf32, #tpu.memory_space<vmem>>, vector<1x16xf32>
    tpu.vector_store %arg10[%c0_39, %c192], %43 {strides = array<i32>} : memref<8x512xf32, #tpu.memory_space<vmem>>, vector<1x16xf32>,
    %c13 = arith.constant 13 : index
    %c0_40 = arith.constant 0 : index
    %45 = vector.load %arg9[%c13, %c0_40] : memref<32x128xf32, #tpu.memory_space<vmem>>, vector<1x16xf32>
    %c0_41 = arith.constant 0 : index
    %c208 = arith.constant 208 : index
    %46 = vector.load %arg10[%c0_41, %c208] : memref<8x512xf32, #tpu.memory_space<vmem>>, vector<1x16xf32>
    tpu.vector_store %arg10[%c0_41, %c208], %45 {strides = array<i32>} : memref<8x512xf32, #tpu.memory_space<vmem>>, vector<1x16xf32>,
    %c14 = arith.constant 14 : index
    %c0_42 = arith.constant 0 : index
    %47 = vector.load %arg9[%c14, %c0_42] : memref<32x128xf32, #tpu.memory_space<vmem>>, vector<1x16xf32>
    %c0_43 = arith.constant 0 : index
    %c224 = arith.constant 224 : index
    %48 = vector.load %arg10[%c0_43, %c224] : memref<8x512xf32, #tpu.memory_space<vmem>>, vector<1x16xf32>
    tpu.vector_store %arg10[%c0_43, %c224], %47 {strides = array<i32>} : memref<8x512xf32, #tpu.memory_space<vmem>>, vector<1x16xf32>,
    %c15 = arith.constant 15 : index
    %c0_44 = arith.constant 0 : index
    %49 = vector.load %arg9[%c15, %c0_44] : memref<32x128xf32, #tpu.memory_space<vmem>>, vector<1x16xf32>
    %c0_45 = arith.constant 0 : index
    %c240 = arith.constant 240 : index
    %50 = vector.load %arg10[%c0_45, %c240] : memref<8x512xf32, #tpu.memory_space<vmem>>, vector<1x16xf32>
    tpu.vector_store %arg10[%c0_45, %c240], %49 {strides = array<i32>} : memref<8x512xf32, #tpu.memory_space<vmem>>, vector<1x16xf32>,
    %c16_46 = arith.constant 16 : index
    %c0_47 = arith.constant 0 : index
    %51 = vector.load %arg9[%c16_46, %c0_47] : memref<32x128xf32, #tpu.memory_space<vmem>>, vector<1x16xf32>
    %c0_48 = arith.constant 0 : index
    %c256 = arith.constant 256 : index
    %52 = vector.load %arg10[%c0_48, %c256] : memref<8x512xf32, #tpu.memory_space<vmem>>, vector<1x16xf32>
    tpu.vector_store %arg10[%c0_48, %c256], %51 {strides = array<i32>} : memref<8x512xf32, #tpu.memory_space<vmem>>, vector<1x16xf32>,
    %c17 = arith.constant 17 : index
    %c0_49 = arith.constant 0 : index
    %53 = vector.load %arg9[%c17, %c0_49] : memref<32x128xf32, #tpu.memory_space<vmem>>, vector<1x16xf32>
    %c0_50 = arith.constant 0 : index
    %c272 = arith.constant 272 : index
    %54 = vector.load %arg10[%c0_50, %c272] : memref<8x512xf32, #tpu.memory_space<vmem>>, vector<1x16xf32>
    tpu.vector_store %arg10[%c0_50, %c272], %53 {strides = array<i32>} : memref<8x512xf32, #tpu.memory_space<vmem>>, vector<1x16xf32>,
    %c18 = arith.constant 18 : index
    %c0_51 = arith.constant 0 : index
    %55 = vector.load %arg9[%c18, %c0_51] : memref<32x128xf32, #tpu.memory_space<vmem>>, vector<1x16xf32>
    %c0_52 = arith.constant 0 : index
    %c288 = arith.constant 288 : index
    %56 = vector.load %arg10[%c0_52, %c288] : memref<8x512xf32, #tpu.memory_space<vmem>>, vector<1x16xf32>
    tpu.vector_store %arg10[%c0_52, %c288], %55 {strides = array<i32>} : memref<8x512xf32, #tpu.memory_space<vmem>>, vector<1x16xf32>,
    %c19 = arith.constant 19 : index
    %c0_53 = arith.constant 0 : index
    %57 = vector.load %arg9[%c19, %c0_53] : memref<32x128xf32, #tpu.memory_space<vmem>>, vector<1x16xf32>
    %c0_54 = arith.constant 0 : index
    %c304 = arith.constant 304 : index
    %58 = vector.load %arg10[%c0_54, %c304] : memref<8x512xf32, #tpu.memory_space<vmem>>, vector<1x16xf32>
    tpu.vector_store %arg10[%c0_54, %c304], %57 {strides = array<i32>} : memref<8x512xf32, #tpu.memory_space<vmem>>, vector<1x16xf32>,
    %c20 = arith.constant 20 : index
    %c0_55 = arith.constant 0 : index
    %59 = vector.load %arg9[%c20, %c0_55] : memref<32x128xf32, #tpu.memory_space<vmem>>, vector<1x16xf32>
    %c0_56 = arith.constant 0 : index
    %c320 = arith.constant 320 : index
    %60 = vector.load %arg10[%c0_56, %c320] : memref<8x512xf32, #tpu.memory_space<vmem>>, vector<1x16xf32>
    tpu.vector_store %arg10[%c0_56, %c320], %59 {strides = array<i32>} : memref<8x512xf32, #tpu.memory_space<vmem>>, vector<1x16xf32>,
    %c21 = arith.constant 21 : index
    %c0_57 = arith.constant 0 : index
    %61 = vector.load %arg9[%c21, %c0_57] : memref<32x128xf32, #tpu.memory_space<vmem>>, vector<1x16xf32>
    %c0_58 = arith.constant 0 : index
    %c336 = arith.constant 336 : index
    %62 = vector.load %arg10[%c0_58, %c336] : memref<8x512xf32, #tpu.memory_space<vmem>>, vector<1x16xf32>
    tpu.vector_store %arg10[%c0_58, %c336], %61 {strides = array<i32>} : memref<8x512xf32, #tpu.memory_space<vmem>>, vector<1x16xf32>,
    %c22 = arith.constant 22 : index
    %c0_59 = arith.constant 0 : index
    %63 = vector.load %arg9[%c22, %c0_59] : memref<32x128xf32, #tpu.memory_space<vmem>>, vector<1x16xf32>
    %c0_60 = arith.constant 0 : index
    %c352 = arith.constant 352 : index
    %64 = vector.load %arg10[%c0_60, %c352] : memref<8x512xf32, #tpu.memory_space<vmem>>, vector<1x16xf32>
    tpu.vector_store %arg10[%c0_60, %c352], %63 {strides = array<i32>} : memref<8x512xf32, #tpu.memory_space<vmem>>, vector<1x16xf32>,
    %c23 = arith.constant 23 : index
    %c0_61 = arith.constant 0 : index
    %65 = vector.load %arg9[%c23, %c0_61] : memref<32x128xf32, #tpu.memory_space<vmem>>, vector<1x16xf32>
    %c0_62 = arith.constant 0 : index
    %c368 = arith.constant 368 : index
    %66 = vector.load %arg10[%c0_62, %c368] : memref<8x512xf32, #tpu.memory_space<vmem>>, vector<1x16xf32>
    tpu.vector_store %arg10[%c0_62, %c368], %65 {strides = array<i32>} : memref<8x512xf32, #tpu.memory_space<vmem>>, vector<1x16xf32>,
    %c24 = arith.constant 24 : index
    %c0_63 = arith.constant 0 : index
    %67 = vector.load %arg9[%c24, %c0_63] : memref<32x128xf32, #tpu.memory_space<vmem>>, vector<1x16xf32>
    %c0_64 = arith.constant 0 : index
    %c384 = arith.constant 384 : index
    %68 = vector.load %arg10[%c0_64, %c384] : memref<8x512xf32, #tpu.memory_space<vmem>>, vector<1x16xf32>
    tpu.vector_store %arg10[%c0_64, %c384], %67 {strides = array<i32>} : memref<8x512xf32, #tpu.memory_space<vmem>>, vector<1x16xf32>,
    %c0_65 = arith.constant 0 : index
    %c0_66 = arith.constant 0 : index
    %69 = vector.load %arg10[%c0_65, %c0_66] : memref<8x512xf32, #tpu.memory_space<vmem>>, vector<8x512xf32>
    %70 = arith.truncf %69 : vector<8x512xf32> to vector<8x512xbf16>
    %c0_67 = arith.constant 0 : index
    %c0_68 = arith.constant 0 : index
    %71 = vector.load %arg4[%c0_67, %c0_68] : memref<512x128xbf16, #tpu.memory_space<vmem>>, vector<512x128xbf16>
    %cst_69 = arith.constant dense<0.000000e+00> : vector<8x128xf32>
    %72 = tpu.matmul %70, %71, %cst_69 {dimension_numbers = #tpu.dot_dimension_numbers<[1], [0], [0], [1], [0, 0, 1, 1], [], []>} : vector<8x512xbf16>, vector<512x128xbf16>, vector<8x128xf32> -> vector<8x128xf32>
    %c0_70 = arith.constant 0 : index
    %c0_71 = arith.constant 0 : index
    %73 = vector.load %arg5[%c0_70, %c0_71] : memref<1x128xf32, #tpu.memory_space<vmem>>, vector<1x128xf32>
    %74 = vector.broadcast %73 : vector<1x128xf32> to vector<8x128xf32>
    %75 = arith.addf %72, %74 : vector<8x128xf32>
    %cst_72 = arith.constant 0.000000e+00 : f32
    %76 = vector.broadcast %cst_72 : f32 to vector<8x128xf32>
    %77 = arith.maximumf %75, %76 : vector<8x128xf32>
    %78 = arith.truncf %77 : vector<8x128xf32> to vector<8x128xbf16>
    %c0_73 = arith.constant 0 : index
    %c0_74 = arith.constant 0 : index
    %79 = vector.load %arg6[%c0_73, %c0_74] : memref<128x128xbf16, #tpu.memory_space<vmem>>, vector<128x128xbf16>
    %cst_75 = arith.constant dense<0.000000e+00> : vector<8x128xf32>
    %80 = tpu.matmul %78, %79, %cst_75 {dimension_numbers = #tpu.dot_dimension_numbers<[1], [0], [0], [1], [0, 0, 1, 1], [], []>} : vector<8x128xbf16>, vector<128x128xbf16>, vector<8x128xf32> -> vector<8x128xf32>
    %c0_76 = arith.constant 0 : index
    %c0_77 = arith.constant 0 : index
    %81 = vector.load %arg7[%c0_76, %c0_77] : memref<1x128xf32, #tpu.memory_space<vmem>>, vector<1x128xf32>
    %82 = vector.broadcast %81 : vector<1x128xf32> to vector<8x128xf32>
    %83 = arith.addf %80, %82 : vector<8x128xf32>
    %cst_78 = arith.constant 0.000000e+00 : f32
    %84 = vector.broadcast %cst_78 : f32 to vector<8x128xf32>
    %85 = arith.maximumf %83, %84 : vector<8x128xf32>
    %c0_79 = arith.constant 0 : index
    %c0_80 = arith.constant 0 : index
    %c0_81 = arith.constant 0 : index
    %86 = vector.load %arg8[%c0_79, %c0_80, %c0_81] : memref<1x8x128xf32, #tpu.memory_space<vmem>>, vector<1x8x128xf32>
    %87 = vector.shape_cast %86 : vector<1x8x128xf32> to vector<8x128xf32>
    %88 = vector.shape_cast %85 : vector<8x128xf32> to vector<1x8x128xf32>
    tpu.vector_store %arg8[%c0_79, %c0_80, %c0_81], %88 {strides = array<i32>} : memref<1x8x128xf32, #tpu.memory_space<vmem>>, vector<1x8x128xf32>,
    return
  }
  func.func @transform_0(%arg0: i32) -> (i32, i32, i32) {
    %c0_i32 = arith.constant 0 : i32
    %c0_i32_0 = arith.constant 0 : i32
    %c0_i32_1 = arith.constant 0 : i32
    return %arg0, %c0_i32, %c0_i32_0 : i32, i32, i32
  }
  func.func @transform_1(%arg0: i32) -> (i32, i32) {
    %c0_i32 = arith.constant 0 : i32
    %c0_i32_0 = arith.constant 0 : i32
    %c0_i32_1 = arith.constant 0 : i32
    return %c0_i32, %c0_i32_0 : i32, i32
  }
  func.func @transform_2(%arg0: i32) -> (i32, i32) {
    %c0_i32 = arith.constant 0 : i32
    %c0_i32_0 = arith.constant 0 : i32
    %c0_i32_1 = arith.constant 0 : i32
    return %c0_i32, %c0_i32_0 : i32, i32
  }
  func.func @transform_3(%arg0: i32) -> (i32, i32) {
    %c0_i32 = arith.constant 0 : i32
    %c0_i32_0 = arith.constant 0 : i32
    %c0_i32_1 = arith.constant 0 : i32
    return %c0_i32, %c0_i32_0 : i32, i32
  }
  func.func @transform_4(%arg0: i32) -> (i32, i32) {
    %c0_i32 = arith.constant 0 : i32
    %c0_i32_0 = arith.constant 0 : i32
    %c0_i32_1 = arith.constant 0 : i32
    return %c0_i32, %c0_i32_0 : i32, i32
  }
  func.func @transform_5(%arg0: i32) -> (i32, i32) {
    %c0_i32 = arith.constant 0 : i32
    %c0_i32_0 = arith.constant 0 : i32
    %c0_i32_1 = arith.constant 0 : i32
    return %c0_i32, %c0_i32_0 : i32, i32
  }
  func.func @transform_6(%arg0: i32) -> (i32, i32) {
    %c0_i32 = arith.constant 0 : i32
    %c0_i32_0 = arith.constant 0 : i32
    %c0_i32_1 = arith.constant 0 : i32
    return %c0_i32, %c0_i32_0 : i32, i32
  }
  func.func @transform_7(%arg0: i32) -> (i32, i32, i32) {
    %c0_i32 = arith.constant 0 : i32
    %c0_i32_0 = arith.constant 0 : i32
    %c0_i32_1 = arith.constant 0 : i32
    return %arg0, %c0_i32, %c0_i32_0 : i32, i32, i32
  }
}

</mosaic_0001>

<bundles_post_ra>
// kernel: net1_forward.2
= control target key start
LH: loop header
LB: loop body
LE: loop exit
PB: predicated region body
PF: predicated region fallthrough
CT: control target
= control target key end

     0   :  { %s1561_s12 = smov 0   ;;  %s1722_s0 = inlined_call_operand.vmem [shape: bf16[2,800,128], index: 0, kind: input, shape index: {}]   ;;  %s1723_s1 = inlined_call_operand.vmem [shape: bf16[128,128], index: 1, kind: input, shape index: {}]   ;;  %s1724_s2 = inlined_call_operand.vmem [shape: f32[1,128], index: 2, kind: input, shape index: {}]   ;;  %s1725_s3 = inlined_call_operand.vmem [shape: bf16[2,200,128], index: 3, kind: output, shape index: {}]  }
   0x1 LB: > { %s1128_s13 = sadd.s32 4294967295, %s1539_s12   ;;  %p1132_p0 = scmp.ge.s32.totalorder %s1539_s12, 1  ;;  %s1539_s12 = sphi %s1561_s12, %s13_s12  }
   0x2   : > { %p137_p1 = scmp.lt.s32.totalorder %s1539_s12, 3 }
   0x4   : > { %p138_p2 = pnand %p1132_p0, %p137_p1 }
   0x5   : > { %p161_p3 = scmp.lt.s32.totalorder (!%p138_p2), %s1128_s13, 1 }
   0x6   : > { %141 = sbr.rel (%p138_p2) target bundleno = 387 (0x183), region = 32 }
   0xb   : > { %v1426_v0 = vld [vmem:[%s1723_s1 + $0x38] sm:$0xff]  ;;  %v1425_v1 = vld [vmem:[%s1723_s1 + $0x30] sm:$0xff]  ;;  %v1424_v2 = vld [vmem:[%s1723_s1 + $0x28] sm:$0xff]  ;;  %s1727_s13 = smov (!%p161_p3, %s1128_s13), 1 }
   0xc   : > { %635 = vmatpush.bf16.msra.mxu0 %v1426_v0  ;;  %1499 = vmatpush.bf16.msra.mxu2 %v1426_v0  ;;  %v1423_v3 = vld [vmem:[%s1723_s1 + $0x20] sm:$0xff]  ;;  %v1422_v4 = vld [vmem:[%s1723_s1 + $0x18] sm:$0xff]  ;;  %v1421_v5 = vld [vmem:[%s1723_s1 + $0x10] sm:$0xff]  ;;  %s1522_s28 = smul.u32 400, %s1727_s13 }
   0xd   : > { %1500 = vmatpush.bf16.msra.mxu3 %v1426_v0  ;;  %1498 = vmatpush.bf16.msra.mxu1 %v1426_v0  ;;  %v1420_v6 = vld [vmem:[%s1723_s1 + $0x8] sm:$0xff]  ;;  %v1419_v7 = vld [vmem:[%s1723_s1] sm:$0xff]  ;;  %s1523_s9 = smul.u32 100, %s1727_s13 }
   0xe   : > { %s1603_s6 = scalar_lea.vmem %s1722_s0, %s1522_s28 }
   0xf   : > { %v1369_v8 = vld [vmem:[%s1603_s6] sm:$0xff]  ;;  %v1406_v10 = vld [vmem:[%s1603_s6 + $0x128] sm:$0xff]  ;;  %v1407_v14 = vld [vmem:[%s1603_s6 + $0x130] sm:$0xff]  ;;  %s1670_s14 = scalar_lea.vmem %s1725_s3, %s1523_s9 }
  0x10   : > { %636 = vmatpush.bf16.msra.mxu0 %v1425_v1  ;;  %1502 = vmatpush.bf16.msra.mxu2 %v1425_v1  ;;  %v1393_v9 = vld [vmem:[%s1603_s6 + $0xc0] sm:$0xff]  ;;  %v1370_v12 = vld [vmem:[%s1603_s6 + $0x8] sm:$0xff]  ;;  %v1371_v16 = vld [vmem:[%s1603_s6 + $0x10] sm:$0xff] }
  0x11   : > { %1503 = vmatpush.bf16.msra.mxu3 %v1425_v1  ;;  %1501 = vmatpush.bf16.msra.mxu1 %v1425_v1  ;;  %v1381_v11 = vld [vmem:[%s1603_s6 + $0x60] sm:$0xff]  ;;  %v1394_v13 = vld [vmem:[%s1603_s6 + $0xc8] sm:$0xff]  ;;  %v1395_v17 = vld [vmem:[%s1603_s6 + $0xd0] sm:$0xff] }
  0x12   : > { %v1382_v15 = vld [vmem:[%s1603_s6 + $0x68] sm:$0xff]  ;;  %v1408_v18 = vld [vmem:[%s1603_s6 + $0x138] sm:$0xff]  ;;  %v1383_v19 = vld [vmem:[%s1603_s6 + $0x70] sm:$0xff] }
  0x13   : > { %v1372_v20 = vld [vmem:[%s1603_s6 + $0x18] sm:$0xff]  ;;  %v1409_v22 = vld [vmem:[%s1603_s6 + $0x140] sm:$0xff]  ;;  %v1410_v26 = vld [vmem:[%s1603_s6 + $0x148] sm:$0xff] }
  0x14   : > { %637 = vmatpush.bf16.msra.mxu0 %v1424_v2  ;;  %1505 = vmatpush.bf16.msra.mxu2 %v1424_v2  ;;  %v1396_v21 = vld [vmem:[%s1603_s6 + $0xd8] sm:$0xff]  ;;  %v1373_v24 = vld [vmem:[%s1603_s6 + $0x20] sm:$0xff]  ;;  %v1374_v28 = vld [vmem:[%s1603_s6 + $0x28] sm:$0xff] }
  0x15   : > { %1506 = vmatpush.bf16.msra.mxu3 %v1424_v2  ;;  %1504 = vmatpush.bf16.msra.mxu1 %v1424_v2  ;;  %v1384_v23 = vld [vmem:[%s1603_s6 + $0x78] sm:$0xff]  ;;  %v1397_v25 = vld [vmem:[%s1603_s6 + $0xe0] sm:$0xff]  ;;  %v1398_v29 = vld [vmem:[%s1603_s6 + $0xe8] sm:$0xff] }
  0x16   : > { %v1385_v27 = vld [vmem:[%s1603_s6 + $0x80] sm:$0xff]  ;;  %v1411_v30 = vld [vmem:[%s1603_s6 + $0x150] sm:$0xff]  ;;  %v1386_v31 = vld [vmem:[%s1603_s6 + $0x88] sm:$0xff] }
  0x17   : > { %v1375_v32 = vld [vmem:[%s1603_s6 + $0x30] sm:$0xff]  ;;  %v1412_v34 = vld [vmem:[%s1603_s6 + $0x158] sm:$0xff]  ;;  %v1413_v38 = vld [vmem:[%s1603_s6 + $0x160] sm:$0xff] }
  0x18   : > { %638 = vmatpush.bf16.msra.mxu0 %v1423_v3  ;;  %1508 = vmatpush.bf16.msra.mxu2 %v1423_v3  ;;  %v1399_v33 = vld [vmem:[%s1603_s6 + $0xf0] sm:$0xff]  ;;  %v1376_v36 = vld [vmem:[%s1603_s6 + $0x38] sm:$0xff]  ;;  %v1377_v40 = vld [vmem:[%s1603_s6 + $0x40] sm:$0xff] }
  0x19   : > { %1509 = vmatpush.bf16.msra.mxu3 %v1423_v3  ;;  %1507 = vmatpush.bf16.msra.mxu1 %v1423_v3  ;;  %v1387_v35 = vld [vmem:[%s1603_s6 + $0x90] sm:$0xff]  ;;  %v1400_v37 = vld [vmem:[%s1603_s6 + $0xf8] sm:$0xff]  ;;  %v1401_v41 = vld [vmem:[%s1603_s6 + $0x100] sm:$0xff] }
  0x1a   : > { %v1388_v39 = vld [vmem:[%s1603_s6 + $0x98] sm:$0xff]  ;;  %v1414_v43 = vld [vmem:[%s1603_s6 + $0x168] sm:$0xff]  ;;  %v1389_v44 = vld [vmem:[%s1603_s6 + $0xa0] sm:$0xff] }
  0x1b   : > { %v1378_v53 = vld [vmem:[%s1603_s6 + $0x48] sm:$0xff]  ;;  %v1415_v56 = vld [vmem:[%s1603_s6 + $0x170] sm:$0xff]  ;;  %v1658_v2 = vld [vmem:[%s1724_s2] ss:$0 sm:$0xff] }
  0x1c   : > { %639 = vmatpush.bf16.msra.mxu0 %v1422_v4  ;;  %1511 = vmatpush.bf16.msra.mxu2 %v1422_v4  ;;  %v1402_v54 = vld [vmem:[%s1603_s6 + $0x108] sm:$0xff] }
  0x1d   : > { %1512 = vmatpush.bf16.msra.mxu3 %v1422_v4  ;;  %1510 = vmatpush.bf16.msra.mxu1 %v1422_v4  ;;  %v1390_v57 = vld [vmem:[%s1603_s6 + $0xa8] sm:$0xff] }
  0x20   : > { %640 = vmatpush.bf16.msra.mxu0 %v1421_v5  ;;  %1514 = vmatpush.bf16.msra.mxu2 %v1421_v5 }
  0x21   : > { %1515 = vmatpush.bf16.msra.mxu3 %v1421_v5  ;;  %1513 = vmatpush.bf16.msra.mxu1 %v1421_v5 }
  0x24   : > { %641 = vmatpush.bf16.msra.mxu0 %v1420_v6  ;;  %1517 = vmatpush.bf16.msra.mxu2 %v1420_v6 }
  0x25   : > { %1518 = vmatpush.bf16.msra.mxu3 %v1420_v6  ;;  %1516 = vmatpush.bf16.msra.mxu1 %v1420_v6 }
  0x28   : > { %642 = vmatpush.bf16.msra.mxu0 %v1419_v7  ;;  %1520 = vmatpush.bf16.msra.mxu2 %v1419_v7 }
  0x29   : > { %1521 = vmatpush.bf16.msra.mxu3 %v1419_v7  ;;  %1519 = vmatpush.bf16.msra.mxu1 %v1419_v7  ;;  %v1379_v7 = vld [vmem:[%s1603_s6 + $0x50] sm:$0xff] }
  0x2b   : > { %643 = vmatmul.bf16.vlgmr.msra.gmra.mxu0 %v1369_v8  ;;  %763 = vmatmul.bf16.vlgmr.msra.gmra.mxu2 %v1393_v9  ;;  %v1403_v8 = vld [vmem:[%s1603_s6 + $0x110] sm:$0xff] }
  0x2c   : > { %828 = vmatmul.bf16.vlgmr.msra.gmra.mxu3 %v1406_v10  ;;  %703 = vmatmul.bf16.vlgmr.msra.gmra.mxu1 %v1381_v11  ;;  %v1416_v10 = vld [vmem:[%s1603_s6 + $0x178] sm:$0xff]  ;;  %v1391_v11 = vld [vmem:[%s1603_s6 + $0xb0] sm:$0xff] }
  0x3b   : > { %648 = vmatmul.bf16.gmra.mxu0 %v1370_v12  ;;  %768 = vmatmul.bf16.gmra.mxu2 %v1394_v13 }
  0x3c   : > { %833 = vmatmul.bf16.gmra.mxu3 %v1407_v14  ;;  %708 = vmatmul.bf16.gmra.mxu1 %v1382_v15 }
  0x4b   : > { %653 = vmatmul.bf16.gmra.mxu0 %v1371_v16  ;;  %773 = vmatmul.bf16.gmra.mxu2 %v1395_v17 }
  0x4c   : > { %838 = vmatmul.bf16.gmra.mxu3 %v1408_v18  ;;  %713 = vmatmul.bf16.gmra.mxu1 %v1383_v19 }
  0x5b   : > { %658 = vmatmul.bf16.gmra.mxu0 %v1372_v20  ;;  %778 = vmatmul.bf16.gmra.mxu2 %v1396_v21 }
  0x5c   : > { %843 = vmatmul.bf16.gmra.mxu3 %v1409_v22  ;;  %718 = vmatmul.bf16.gmra.mxu1 %v1384_v23 }
  0x6b   : > { %663 = vmatmul.bf16.gmra.mxu0 %v1373_v24  ;;  %783 = vmatmul.bf16.gmra.mxu2 %v1397_v25 }
  0x6c   : > { %848 = vmatmul.bf16.gmra.mxu3 %v1410_v26  ;;  %723 = vmatmul.bf16.gmra.mxu1 %v1385_v27 }
  0x7b   : > { %668 = vmatmul.bf16.gmra.mxu0 %v1374_v28  ;;  %788 = vmatmul.bf16.gmra.mxu2 %v1398_v29 }
  0x7c   : > { %853 = vmatmul.bf16.gmra.mxu3 %v1411_v30  ;;  %728 = vmatmul.bf16.gmra.mxu1 %v1386_v31  ;;  %v1380_v30 = vld [vmem:[%s1603_s6 + $0x58] sm:$0xff] }
  0x7d   : > { %v1404_v31 = vld [vmem:[%s1603_s6 + $0x118] sm:$0xff] }
  0x8b   : > { %673 = vmatmul.bf16.gmra.mxu0 %v1375_v32  ;;  %793 = vmatmul.bf16.gmra.mxu2 %v1399_v33  ;;  %v1417_v33 = vld [vmem:[%s1603_s6 + $0x180] sm:$0xff] }
  0x8c   : > { %858 = vmatmul.bf16.gmra.mxu3 %v1412_v34  ;;  %733 = vmatmul.bf16.gmra.mxu1 %v1387_v35  ;;  %v1392_v34 = vld [vmem:[%s1603_s6 + $0xb8] sm:$0xff] }
  0x9b   : > { %678 = vmatmul.bf16.gmra.mxu0 %v1376_v36  ;;  %798 = vmatmul.bf16.gmra.mxu2 %v1400_v37 }
  0x9c   : > { %863 = vmatmul.bf16.gmra.mxu3 %v1413_v38  ;;  %738 = vmatmul.bf16.gmra.mxu1 %v1388_v39 }
  0xa8   : > { %v644_v42 = vpop.f32.mrf.mxu0 }
  0xa9   : > { %v1641_v45 = vpop.f32.mrf.mxu1 }
  0xab   : > { %683 = vmatmul.bf16.gmra.mxu0 %v1377_v40  ;;  %803 = vmatmul.bf16.gmra.mxu2 %v1401_v41 }
  0xac   : > { %868 = vmatmul.bf16.gmra.mxu3 %v1414_v43  ;;  %743 = vmatmul.bf16.gmra.mxu1 %v1389_v44 }
  0xae   : > { %v1643_v46 = vpop.f32.mrf.mxu2 }
  0xaf   : > { %v1645_v47 = vpop.f32.mrf.mxu3 }
  0xb0   : > { %v646_v48 = vpop.f32.mrf.mxu0 }
  0xb1   : > { %v706_v49 = vpop.f32.mrf.mxu1 }
  0xb2   : > { %v894_v62 = vmax.f32 %v644_v42, %v706_v49 }
  0xb6   : > { %v1647_v50 = vpop.f32.mrf.mxu2 }
  0xb7   : > { %v918_v51 = vmax.f32 %v1641_v45, %v1647_v50  ;;  %v831_v52 = vpop.f32.mrf.mxu3 }
  0xb8   : > { %v649_v55 = vpop.f32.mrf.mxu0 }
  0xb9   : > { %v709_v58 = vpop.f32.mrf.mxu1 }
  0xba   : > { %v895_v4 = vmax.f32 %v646_v48, %v709_v58  ;;  %v1405_v58 = vld [vmem:[%s1603_s6 + $0x120] sm:$0xff] }
  0xbb   : > { %688 = vmatmul.bf16.gmra.mxu0 %v1378_v53  ;;  %808 = vmatmul.bf16.gmra.mxu2 %v1402_v54 }
  0xbc   : > { %873 = vmatmul.bf16.gmra.mxu3 %v1415_v56  ;;  %748 = vmatmul.bf16.gmra.mxu1 %v1390_v57 }
  0xbe   : > { %v769_v59 = vpop.f32.mrf.mxu2 }
  0xbf   : > { %v834_v60 = vpop.f32.mrf.mxu3  ;;  %v919_v63 = vmax.f32 %v769_v59, %v831_v52 }
  0xc0   : > { %v651_v61 = vpop.f32.mrf.mxu0 }
  0xc1   : > { %v711_v0 = vpop.f32.mrf.mxu1  ;;  %v944_v1 = vmax.f32 %v894_v62, %v919_v63 }
  0xc2   : > { %v896_v22 = vmax.f32 %v649_v55, %v711_v0 }
  0xc3   : > { %v973_v12 = vadd.f32 %v1658_v2, %v944_v1 }
  0xc5   : > { %v998_v16 = vmax.f32 %v973_v12, 0.0 }
  0xc6   : > { %v771_v3 = vpop.f32.mrf.mxu2 }
  0xc7   : > { %v920_v5 = vmax.f32 %v771_v3, %v834_v60  ;;  %v836_v6 = vpop.f32.mrf.mxu3  ;;  %v1418_v60 = vld [vmem:[%s1603_s6 + $0x188] sm:$0xff] }
  0xc8   : > { %v654_v9 = vpop.f32.mrf.mxu0 }
  0xc9   : > { %v945_v13 = vmax.f32 %v895_v4, %v920_v5  ;;  %v714_v14 = vpop.f32.mrf.mxu1 }
  0xca   : > { %v897_v27 = vmax.f32 %v651_v61, %v714_v14 }
  0xcb   : > { %v974_v15 = vadd.f32 %v1658_v2, %v945_v13  ;;  %693 = vmatmul.bf16.gmra.mxu0 %v1379_v7  ;;  %813 = vmatmul.bf16.gmra.mxu2 %v1403_v8 }
  0xcc   : > { %878 = vmatmul.bf16.gmra.mxu3 %v1416_v10  ;;  %753 = vmatmul.bf16.gmra.mxu1 %v1391_v11 }
  0xcd   : > { %v999_v17 = vmax.f32 %v974_v15, 0.0 }
  0xce   : > { %v774_v18 = vpop.f32.mrf.mxu2 }
  0xcf   : > { %v1430_v19 = vpack.c.bf16 %v999_v17, %v998_v16  ;;  %v839_v20 = vpop.f32.mrf.mxu3  ;;  %v921_v23 = vmax.f32 %v774_v18, %v836_v6 }
  0xd0   : > { %v656_v21 = vpop.f32.mrf.mxu0 }
  0xd1   : > { %1431 = vst [vmem:[%s1670_s14] sm:$0xff] %v1430_v19   ;;  %v716_v24 = vpop.f32.mrf.mxu1  ;;  %v946_v25 = vmax.f32 %v896_v22, %v921_v23 }
  0xd2   : > { %v898_v48 = vmax.f32 %v654_v9, %v716_v24 }
  0xd3   : > { %v975_v35 = vadd.f32 %v1658_v2, %v946_v25 }
  0xd5   : > { %v1000_v39 = vmax.f32 %v975_v35, 0.0 }
  0xd6   : > { %v776_v26 = vpop.f32.mrf.mxu2 }
  0xd7   : > { %v922_v28 = vmax.f32 %v776_v26, %v839_v20  ;;  %v841_v29 = vpop.f32.mrf.mxu3 }
  0xd8   : > { %v659_v32 = vpop.f32.mrf.mxu0 }
  0xd9   : > { %v947_v36 = vmax.f32 %v897_v27, %v922_v28  ;;  %v719_v37 = vpop.f32.mrf.mxu1 }
  0xda   : > { %v899_v55 = vmax.f32 %v656_v21, %v719_v37 }
  0xdb   : > { %v976_v38 = vadd.f32 %v1658_v2, %v947_v36  ;;  %698 = vmatmul.bf16.gmra.mxu0 %v1380_v30  ;;  %818 = vmatmul.bf16.gmra.mxu2 %v1404_v31 }
  0xdc   : > { %883 = vmatmul.bf16.gmra.mxu3 %v1417_v33  ;;  %758 = vmatmul.bf16.gmra.mxu1 %v1392_v34 }
  0xdd   : > { %v1001_v40 = vmax.f32 %v976_v38, 0.0 }
  0xde   : > { %v779_v41 = vpop.f32.mrf.mxu2 }
  0xdf   : > { %v1435_v42 = vpack.c.bf16 %v1001_v40, %v1000_v39  ;;  %v844_v43 = vpop.f32.mrf.mxu3  ;;  %v923_v49 = vmax.f32 %v779_v41, %v841_v29 }
  0xe0   : > { %v661_v44 = vpop.f32.mrf.mxu0 }
  0xe1   : > { %1487 = vst [vmem:[%s1670_s14 + $0x8] sm:$0xff] %v1435_v42   ;;  %v721_v52 = vpop.f32.mrf.mxu1  ;;  %v948_v53 = vmax.f32 %v898_v48, %v923_v49 }
  0xe2   : > { %v900_v8 = vmax.f32 %v659_v32, %v721_v52 }
  0xe3   : > { %v977_v61 = vadd.f32 %v1658_v2, %v948_v53 }
  0xe5   : > { %v1002_v1 = vmax.f32 %v977_v61, 0.0 }
  0xe6   : > { %v781_v54 = vpop.f32.mrf.mxu2 }
  0xe7   : > { %v924_v56 = vmax.f32 %v781_v54, %v844_v43  ;;  %v846_v57 = vpop.f32.mrf.mxu3 }
  0xe8   : > { %v664_v59 = vpop.f32.mrf.mxu0 }
  0xe9   : > { %v949_v62 = vmax.f32 %v899_v55, %v924_v56  ;;  %v724_v63 = vpop.f32.mrf.mxu1 }
  0xea   : > { %v901_v13 = vmax.f32 %v661_v44, %v724_v63 }
  0xeb   : > { %v978_v0 = vadd.f32 %v1658_v2, %v949_v62  ;;  %823 = vmatmul.bf16.gmra.mxu2 %v1405_v58 }
  0xec   : > { %888 = vmatmul.bf16.gmra.mxu3 %v1418_v60 }
  0xed   : > { %v1003_v3 = vmax.f32 %v978_v0, 0.0 }
  0xee   : > { %v784_v4 = vpop.f32.mrf.mxu2 }
  0xef   : > { %v1440_v5 = vpack.c.bf16 %v1003_v3, %v1002_v1  ;;  %v849_v6 = vpop.f32.mrf.mxu3  ;;  %v925_v9 = vmax.f32 %v784_v4, %v846_v57 }
  0xf0   : > { %v666_v7 = vpop.f32.mrf.mxu0 }
  0xf1   : > { %1488 = vst [vmem:[%s1670_s14 + $0x10] sm:$0xff] %v1440_v5   ;;  %v726_v10 = vpop.f32.mrf.mxu1  ;;  %v950_v11 = vmax.f32 %v900_v8, %v925_v9 }
  0xf2   : > { %v902_v27 = vmax.f32 %v664_v59, %v726_v10 }
  0xf3   : > { %v979_v17 = vadd.f32 %v1658_v2, %v950_v11 }
  0xf5   : > { %v1004_v21 = vmax.f32 %v979_v17, 0.0 }
  0xf6   : > { %v786_v12 = vpop.f32.mrf.mxu2 }
  0xf7   : > { %v926_v14 = vmax.f32 %v786_v12, %v849_v6  ;;  %v851_v15 = vpop.f32.mrf.mxu3 }
  0xf8   : > { %v669_v16 = vpop.f32.mrf.mxu0 }
  0xf9   : > { %v951_v18 = vmax.f32 %v901_v13, %v926_v14  ;;  %v729_v19 = vpop.f32.mrf.mxu1 }
  0xfa   : > { %v903_v32 = vmax.f32 %v666_v7, %v729_v19 }
  0xfb   : > { %v980_v20 = vadd.f32 %v1658_v2, %v951_v18 }
  0xfd   : > { %v1005_v22 = vmax.f32 %v980_v20, 0.0 }
  0xfe   : > { %v789_v23 = vpop.f32.mrf.mxu2 }
  0xff   : > { %v1445_v24 = vpack.c.bf16 %v1005_v22, %v1004_v21  ;;  %v854_v25 = vpop.f32.mrf.mxu3  ;;  %v927_v28 = vmax.f32 %v789_v23, %v851_v15 }
 0x100   : > { %v671_v26 = vpop.f32.mrf.mxu0 }
 0x101   : > { %1489 = vst [vmem:[%s1670_s14 + $0x18] sm:$0xff] %v1445_v24   ;;  %v731_v29 = vpop.f32.mrf.mxu1  ;;  %v952_v30 = vmax.f32 %v902_v27, %v927_v28 }
 0x102   : > { %v904_v49 = vmax.f32 %v669_v16, %v731_v29 }
 0x103   : > { %v981_v36 = vadd.f32 %v1658_v2, %v952_v30 }
 0x105   : > { %v1006_v40 = vmax.f32 %v981_v36, 0.0 }
 0x106   : > { %v791_v31 = vpop.f32.mrf.mxu2 }
 0x107   : > { %v928_v33 = vmax.f32 %v791_v31, %v854_v25  ;;  %v856_v34 = vpop.f32.mrf.mxu3 }
 0x108   : > { %v674_v35 = vpop.f32.mrf.mxu0 }
 0x109   : > { %v953_v37 = vmax.f32 %v903_v32, %v928_v33  ;;  %v734_v38 = vpop.f32.mrf.mxu1 }
 0x10a   : > { %v905_v56 = vmax.f32 %v671_v26, %v734_v38 }
 0x10b   : > { %v982_v39 = vadd.f32 %v1658_v2, %v953_v37 }
 0x10d   : > { %v1007_v41 = vmax.f32 %v982_v39, 0.0 }
 0x10e   : > { %v794_v42 = vpop.f32.mrf.mxu2 }
 0x10f   : > { %v1450_v43 = vpack.c.bf16 %v1007_v41, %v1006_v40  ;;  %v859_v44 = vpop.f32.mrf.mxu3  ;;  %v929_v52 = vmax.f32 %v794_v42, %v856_v34 }
 0x110   : > { %v676_v48 = vpop.f32.mrf.mxu0 }
 0x111   : > { %1490 = vst [vmem:[%s1670_s14 + $0x20] sm:$0xff] %v1450_v43   ;;  %v736_v53 = vpop.f32.mrf.mxu1  ;;  %v954_v54 = vmax.f32 %v904_v49, %v929_v52 }
 0x112   : > { %v906_v6 = vmax.f32 %v674_v35, %v736_v53 }
 0x113   : > { %v983_v59 = vadd.f32 %v1658_v2, %v954_v54 }
 0x115   : > { %v1008_v0 = vmax.f32 %v983_v59, 0.0 }
 0x116   : > { %v796_v55 = vpop.f32.mrf.mxu2 }
 0x117   : > { %v930_v57 = vmax.f32 %v796_v55, %v859_v44  ;;  %v861_v58 = vpop.f32.mrf.mxu3 }
 0x118   : > { %v679_v62 = vpop.f32.mrf.mxu0 }
 0x119   : > { %v955_v60 = vmax.f32 %v905_v56, %v930_v57  ;;  %v739_v61 = vpop.f32.mrf.mxu1 }
 0x11a   : > { %v907_v12 = vmax.f32 %v676_v48, %v739_v61 }
 0x11b   : > { %v984_v63 = vadd.f32 %v1658_v2, %v955_v60 }
 0x11d   : > { %v1009_v1 = vmax.f32 %v984_v63, 0.0 }
 0x11e   : > { %v799_v3 = vpop.f32.mrf.mxu2 }
 0x11f   : > { %v1455_v4 = vpack.c.bf16 %v1009_v1, %v1008_v0  ;;  %v864_v5 = vpop.f32.mrf.mxu3  ;;  %v931_v7 = vmax.f32 %v799_v3, %v861_v58 }
 0x120   : > { %v681_v9 = vpop.f32.mrf.mxu0 }
 0x121   : > { %1491 = vst [vmem:[%s1670_s14 + $0x28] sm:$0xff] %v1455_v4   ;;  %v741_v8 = vpop.f32.mrf.mxu1  ;;  %v956_v10 = vmax.f32 %v906_v6, %v931_v7 }
 0x122   : > { %v908_v25 = vmax.f32 %v679_v62, %v741_v8 }
 0x123   : > { %v985_v15 = vadd.f32 %v1658_v2, %v956_v10 }
 0x125   : > { %v1010_v19 = vmax.f32 %v985_v15, 0.0 }
 0x126   : > { %v801_v11 = vpop.f32.mrf.mxu2 }
 0x127   : > { %v932_v13 = vmax.f32 %v801_v11, %v864_v5  ;;  %v866_v14 = vpop.f32.mrf.mxu3 }
 0x128   : > { %v684_v21 = vpop.f32.mrf.mxu0 }
 0x129   : > { %v957_v16 = vmax.f32 %v907_v12, %v932_v13  ;;  %v744_v17 = vpop.f32.mrf.mxu1 }
 0x12a   : > { %v909_v30 = vmax.f32 %v681_v9, %v744_v17 }
 0x12b   : > { %v986_v18 = vadd.f32 %v1658_v2, %v957_v16 }
 0x12d   : > { %v1011_v20 = vmax.f32 %v986_v18, 0.0 }
 0x12e   : > { %v804_v22 = vpop.f32.mrf.mxu2 }
 0x12f   : > { %v1460_v23 = vpack.c.bf16 %v1011_v20, %v1010_v19  ;;  %v869_v24 = vpop.f32.mrf.mxu3  ;;  %v933_v26 = vmax.f32 %v804_v22, %v866_v14 }
 0x130   : > { %v686_v33 = vpop.f32.mrf.mxu0 }
 0x131   : > { %1492 = vst [vmem:[%s1670_s14 + $0x30] sm:$0xff] %v1460_v23   ;;  %v746_v27 = vpop.f32.mrf.mxu1  ;;  %v958_v28 = vmax.f32 %v908_v25, %v933_v26 }
 0x132   : > { %v910_v43 = vmax.f32 %v684_v21, %v746_v27 }
 0x133   : > { %v987_v34 = vadd.f32 %v1658_v2, %v958_v28 }
 0x135   : > { %v1012_v38 = vmax.f32 %v987_v34, 0.0 }
 0x136   : > { %v806_v29 = vpop.f32.mrf.mxu2 }
 0x137   : > { %v934_v31 = vmax.f32 %v806_v29, %v869_v24  ;;  %v871_v32 = vpop.f32.mrf.mxu3 }
 0x138   : > { %v689_v48 = vpop.f32.mrf.mxu0 }
 0x139   : > { %v959_v35 = vmax.f32 %v909_v30, %v934_v31  ;;  %v749_v37 = vpop.f32.mrf.mxu1 }
 0x13a   : > { %v911_v54 = vmax.f32 %v686_v33, %v749_v37 }
 0x13b   : > { %v988_v36 = vadd.f32 %v1658_v2, %v959_v35 }
 0x13d   : > { %v1013_v39 = vmax.f32 %v988_v36, 0.0 }
 0x13e   : > { %v809_v40 = vpop.f32.mrf.mxu2 }
 0x13f   : > { %v1465_v41 = vpack.c.bf16 %v1013_v39, %v1012_v38  ;;  %v874_v42 = vpop.f32.mrf.mxu3  ;;  %v935_v44 = vmax.f32 %v809_v40, %v871_v32 }
 0x140   : > { %v691_v60 = vpop.f32.mrf.mxu0 }
 0x141   : > { %1493 = vst [vmem:[%s1670_s14 + $0x38] sm:$0xff] %v1465_v41   ;;  %v960_v49 = vmax.f32 %v910_v43, %v935_v44  ;;  %v751_v52 = vpop.f32.mrf.mxu1 }
 0x142   : > { %v912_v4 = vmax.f32 %v689_v48, %v751_v52 }
 0x143   : > { %v989_v57 = vadd.f32 %v1658_v2, %v960_v49 }
 0x145   : > { %v1014_v61 = vmax.f32 %v989_v57, 0.0 }
 0x146   : > { %v811_v53 = vpop.f32.mrf.mxu2 }
 0x147   : > { %v936_v55 = vmax.f32 %v811_v53, %v874_v42  ;;  %v876_v56 = vpop.f32.mrf.mxu3 }
 0x148   : > { %v694_v7 = vpop.f32.mrf.mxu0 }
 0x149   : > { %v961_v58 = vmax.f32 %v911_v54, %v936_v55  ;;  %v754_v3 = vpop.f32.mrf.mxu1 }
 0x14a   : > { %v913_v9 = vmax.f32 %v691_v60, %v754_v3 }
 0x14b   : > { %v990_v59 = vadd.f32 %v1658_v2, %v961_v58 }
 0x14d   : > { %v1015_v62 = vmax.f32 %v990_v59, 0.0 }
 0x14e   : > { %v814_v63 = vpop.f32.mrf.mxu2 }
 0x14f   : > { %v1470_v0 = vpack.c.bf16 %v1015_v62, %v1014_v61  ;;  %v879_v1 = vpop.f32.mrf.mxu3  ;;  %v937_v5 = vmax.f32 %v814_v63, %v876_v56 }
 0x150   : > { %v696_v21 = vpop.f32.mrf.mxu0 }
 0x151   : > { %1494 = vst [vmem:[%s1670_s14 + $0x40] sm:$0xff] %v1470_v0   ;;  %v962_v6 = vmax.f32 %v912_v4, %v937_v5  ;;  %v756_v14 = vpop.f32.mrf.mxu1 }
 0x152   : > { %v914_v22 = vmax.f32 %v694_v7, %v756_v14 }
 0x153   : > { %v991_v12 = vadd.f32 %v1658_v2, %v962_v6 }
 0x155   : > { %v1016_v16 = vmax.f32 %v991_v12, 0.0 }
 0x156   : > { %v816_v8 = vpop.f32.mrf.mxu2 }
 0x157   : > { %v938_v10 = vmax.f32 %v816_v8, %v879_v1  ;;  %v881_v11 = vpop.f32.mrf.mxu3 }
 0x158   : > { %v699_v32 = vpop.f32.mrf.mxu0 }
 0x159   : > { %v963_v13 = vmax.f32 %v913_v9, %v938_v10  ;;  %v759_v24 = vpop.f32.mrf.mxu1 }
 0x15a   : > { %v915_v27 = vmax.f32 %v696_v21, %v759_v24 }
 0x15b   : > { %v992_v15 = vadd.f32 %v1658_v2, %v963_v13 }
 0x15d   : > { %v1017_v17 = vmax.f32 %v992_v15, 0.0 }
 0x15e   : > { %v819_v18 = vpop.f32.mrf.mxu2 }
 0x15f   : > { %v1475_v19 = vpack.c.bf16 %v1017_v17, %v1016_v16  ;;  %v884_v20 = vpop.f32.mrf.mxu3  ;;  %v939_v23 = vmax.f32 %v819_v18, %v881_v11 }
 0x160   : > { %v701_v42 = vpop.f32.mrf.mxu0 }
 0x161   : > { %1495 = vst [vmem:[%s1670_s14 + $0x48] sm:$0xff] %v1475_v19   ;;  %v964_v25 = vmax.f32 %v914_v22, %v939_v23  ;;  %v761_v36 = vpop.f32.mrf.mxu1  ;;  %v917_v48 = vmax.f32 %v701_v42, %v1643_v46 }
 0x162   : > { %v916_v40 = vmax.f32 %v699_v32, %v761_v36 }
 0x163   : > { %v993_v30 = vadd.f32 %v1658_v2, %v964_v25 }
 0x165   : > { %v1018_v34 = vmax.f32 %v993_v30, 0.0 }
 0x166   : > { %v821_v26 = vpop.f32.mrf.mxu2 }
 0x167   : > { %v940_v28 = vmax.f32 %v821_v26, %v884_v20  ;;  %v886_v29 = vpop.f32.mrf.mxu3 }
 0x169   : > { %v965_v31 = vmax.f32 %v915_v27, %v940_v28 }
 0x16b   : > { %v994_v33 = vadd.f32 %v1658_v2, %v965_v31 }
 0x16d   : > { %v1019_v35 = vmax.f32 %v994_v33, 0.0 }
 0x16e   : > { %v824_v37 = vpop.f32.mrf.mxu2 }
 0x16f   : > { %v1480_v38 = vpack.c.bf16 %v1019_v35, %v1018_v34  ;;  %v889_v39 = vpop.f32.mrf.mxu3  ;;  %v941_v41 = vmax.f32 %v824_v37, %v886_v29 }
 0x171   : > { %1496 = vst [vmem:[%s1670_s14 + $0x50] sm:$0xff] %v1480_v38   ;;  %v966_v43 = vmax.f32 %v916_v40, %v941_v41 }
 0x173   : > { %v995_v54 = vadd.f32 %v1658_v2, %v966_v43 }
 0x175   : > { %v1020_v59 = vmax.f32 %v995_v54, 0.0 }
 0x176   : > { %v826_v44 = vpop.f32.mrf.mxu2 }
 0x177   : > { %v942_v49 = vmax.f32 %v826_v44, %v889_v39  ;;  %v891_v52 = vpop.f32.mrf.mxu3 }
 0x178   : > { %v943_v53 = vmax.f32 %v1645_v47, %v891_v52 }
 0x179   : > { %v967_v55 = vmax.f32 %v917_v48, %v942_v49 }
 0x17a   : > { %v968_v56 = vmax.f32 %v918_v51, %v943_v53 }
 0x17b   : > { %v996_v57 = vadd.f32 %v1658_v2, %v967_v55 }
 0x17c   : > { %v997_v58 = vadd.f32 %v1658_v2, %v968_v56 }
 0x17d   : > { %v1021_v60 = vmax.f32 %v996_v57, 0.0 }
 0x17e   : > { %v1022_v61 = vmax.f32 %v997_v58, 0.0 }
 0x17f   : > { %v1485_v62 = vpack.c.bf16 %v1021_v60, %v1020_v59 }
 0x180   : > { %v1047_v46 = vpack.c.bf16 %v1022_v61, %v1022_v61 }
 0x181   : > { %1497 = vst [vmem:[%s1670_s14 + $0x58] sm:$0xff] %v1485_v62  }
 0x182   : > { %1072 = vst [vmem:[%s1670_s14 + $0x60] sm:$0xf] %v1047_v46 }
 0x183 PF: > { %s13_s12 = sadd.s32 1, %s1539_s12  }
 0x184   : > { %p10_p4 = scmp.ge.s32.totalorder %s13_s12, 4  }
 0x186   :  { %12 = sbr.rel (!%p10_p4) target bundleno = 1 (0x1), region = 62 }

// kernel: net1_forward.3
= control target key start
LH: loop header
LB: loop body
LE: loop exit
PB: predicated region body
PF: predicated region fallthrough
CT: control target
= control target key end

     0   :  { %s1693_s24 = smov 0   ;;  %s1978_s0 = inlined_call_operand.vmem [shape: bf16[2,128,256], index: 0, kind: input, shape index: {}]   ;;  %s1979_s1 = inlined_call_operand.vmem [shape: bf16[256,128], index: 1, kind: input, shape index: {}]   ;;  %s1980_s2 = inlined_call_operand.vmem [shape: f32[1,128], index: 2, kind: input, shape index: {}]   ;;  %s1981_s3 = inlined_call_operand.vmem [shape: bf16[512,128], index: 3, kind: input, shape index: {}]   ;;  %s1982_s4 = inlined_call_operand.vmem [shape: f32[1,128], index: 4, kind: input, shape index: {}]   ;;  %s1983_s5 = inlined_call_operand.vmem [shape: bf16[128,128], index: 5, kind: input, shape index: {}]   ;;  %s1984_s6 = inlined_call_operand.vmem [shape: f32[1,128], index: 6, kind: input, shape index: {}]   ;;  %s1985_s7 = inlined_call_operand.vmem [shape: f32[2,8,128], index: 7, kind: output, shape index: {}]  }
   0x1 LB: > { %s1231_s25 = sadd.s32 4294967295, %s1643_s24   ;;  %p1235_p0 = scmp.ge.s32.totalorder %s1643_s24, 1  ;;  %s1643_s24 = sphi %s1693_s24, %s17_s24  }
   0x2   : > { %p237_p1 = scmp.lt.s32.totalorder %s1643_s24, 3 }
   0x4   : > { %p238_p2 = pnand %p1235_p0, %p237_p1 }
   0x5   : > { %p268_p3 = scmp.lt.s32.totalorder (!%p238_p2), %s1231_s25, 1  ;;  %s1646_s20 = smov (!%p238_p2), 64  }
   0x6   : > { %241 = sbr.rel (%p238_p2) target bundleno = 708 (0x2c4), region = 48  ;;  %s1647_s21 = smov (!%p238_p2), 48  }
   0x7   : > { %s1648_s22 = smov (!%p238_p2), 16   ;;  %s1649_s23 = smov (!%p238_p2), 96  }
   0x8   : > { %s1650_s26 = smov (!%p238_p2), 112   ;;  %s1651_s27 = smov (!%p238_p2), 32  }
   0x9   : > { %s1652_s28 = smov (!%p238_p2), 80  }
   0xb   : > { %v1553_v0 = vld [vmem:[%s1979_s1 + $0x38] sm:$0xff]  ;;  %v1552_v2 = vld [vmem:[%s1979_s1 + $0x30] sm:$0xff]  ;;  %v1551_v4 = vld [vmem:[%s1979_s1 + $0x28] sm:$0xff]  ;;  %s1987_s25 = smov (!%p268_p3, %s1231_s25), 1  ;;  %vm632_vm0 = vcmask 122880   ;;  %vm639_vm1 = vcmask 254080  }
   0xc   : > { %v1561_v1 = vld [vmem:[%s1979_s1 + $0x78] sm:$0xff]  ;;  %501 = vmatpush.bf16.msra.mxu0 %v1553_v0  ;;  %v1560_v3 = vld [vmem:[%s1979_s1 + $0x70] sm:$0xff]  ;;  %1602 = vmatpush.bf16.msra.mxu3 %v1553_v0  ;;  %v1559_v5 = vld [vmem:[%s1979_s1 + $0x68] sm:$0xff]  ;;  %s1529_s29 = sshll.u32 %s1987_s25, 7  ;;  %vm646_vm2 = vcmask 385280   ;;  %vm653_vm3 = vcmask 516480  }
   0xd   : > { %550 = vmatpush.bf16.msra.mxu1 %v1561_v1  ;;  %1610 = vmatpush.bf16.msra.mxu2 %v1561_v1  ;;  %v1550_v6 = vld [vmem:[%s1979_s1 + $0x20] sm:$0xff]  ;;  %v1549_v8 = vld [vmem:[%s1979_s1 + $0x18] sm:$0xff]  ;;  %v1548_v10 = vld [vmem:[%s1979_s1 + $0x10] sm:$0xff]  ;;  %s1753_s13 = scalar_lea.vmem %s1978_s0, %s1529_s29  ;;  %vm660_vm4 = vcmask 647680   ;;  %vm667_vm5 = vcmask 778880   ;;  %vm674_vm6 = vcmask 910080  }
   0xe   : > { %v1558_v7 = vld [vmem:[%s1979_s1 + $0x60] sm:$0xff]  ;;  %v1557_v9 = vld [vmem:[%s1979_s1 + $0x58] sm:$0xff]  ;;  %v1556_v11 = vld [vmem:[%s1979_s1 + $0x50] sm:$0xff]  ;;  %vm681_vm7 = vcmask 1041280   ;;  %s1238_s29 = sshll.u32 %s1987_s25, 3 }
   0xf   : > { %v1547_v12 = vld [vmem:[%s1979_s1 + $0x8] sm:$0xff]  ;;  %v1546_v14 = vld [vmem:[%s1979_s1] sm:$0xff]  ;;  %v1249_v22 = vld [vmem:[%s1753_s13 + $0x10] sm:$0xf]  ;;  %s276_s9 = scalar_lea.vmem %s1985_s7, %s1238_s29 }
  0x10   : > { %502 = vmatpush.bf16.msra.mxu0 %v1552_v2  ;;  %1603 = vmatpush.bf16.msra.mxu3 %v1552_v2  ;;  %v1555_v13 = vld [vmem:[%s1979_s1 + $0x48] sm:$0xff]  ;;  %v1554_v15 = vld [vmem:[%s1979_s1 + $0x40] sm:$0xff]  ;;  %v1533_v23 = vld [vmem:[%s1753_s13 + $0x14] sm:$0xf0] }
  0x11   : > { %551 = vmatpush.bf16.msra.mxu1 %v1560_v3  ;;  %1611 = vmatpush.bf16.msra.mxu2 %v1560_v3  ;;  %v1241_v16 = vld [vmem:[%s1753_s13] sm:$0xf]  ;;  %v1531_v17 = vld [vmem:[%s1753_s13 + $0x4] sm:$0xf0]  ;;  %v1530_v18 = vld [vmem:[%s1753_s13 + $0x4] sm:$0xf]  ;;  %v1250_v26 = vor.u32 %v1533_v23, %v1249_v22 }
  0x12   : > { %v1243_v19 = vld [vmem:[%s1753_s13 + $0x8] sm:$0xf0]  ;;  %v1242_v20 = vor.u32 %v1531_v17, %v1241_v16  ;;  %v1532_v24 = vld [vmem:[%s1753_s13 + $0x14] sm:$0xf]  ;;  %v1251_v25 = vld [vmem:[%s1753_s13 + $0x18] sm:$0xf0] }
  0x13   : > { %v1246_v21 = vor.u32 %v1530_v18, %v1243_v19  ;;  %v1254_v27 = vor.u32 %v1532_v24, %v1251_v25  ;;  %v1289_v28 = vld [vmem:[%s1753_s13 + $0x60] sm:$0xf]  ;;  %v1543_v29 = vld [vmem:[%s1753_s13 + $0x64] sm:$0xf0]  ;;  %v1542_v30 = vld [vmem:[%s1753_s13 + $0x64] sm:$0xf] }
  0x14   : > { %503 = vmatpush.bf16.msra.mxu0 %v1551_v4  ;;  %1604 = vmatpush.bf16.msra.mxu3 %v1551_v4  ;;  %v1290_v31 = vor.u32 %v1543_v29, %v1289_v28  ;;  %v1291_v32 = vld [vmem:[%s1753_s13 + $0x68] sm:$0xf0]  ;;  %v1257_v34 = vld [vmem:[%s1753_s13 + $0x20] sm:$0xf]  ;;  %v1535_v35 = vld [vmem:[%s1753_s13 + $0x24] sm:$0xf0] }
  0x15   : > { %552 = vmatpush.bf16.msra.mxu1 %v1559_v5  ;;  %1612 = vmatpush.bf16.msra.mxu2 %v1559_v5  ;;  %v1294_v33 = vor.u32 %v1542_v30, %v1291_v32  ;;  %v1534_v36 = vld [vmem:[%s1753_s13 + $0x24] sm:$0xf]  ;;  %v1259_v37 = vld [vmem:[%s1753_s13 + $0x28] sm:$0xf0]  ;;  %v1258_v38 = vor.u32 %v1535_v35, %v1257_v34  ;;  %v1297_v40 = vld [vmem:[%s1753_s13 + $0x70] sm:$0xf] }
  0x16   : > { %v1262_v39 = vor.u32 %v1534_v36, %v1259_v37  ;;  %v1545_v41 = vld [vmem:[%s1753_s13 + $0x74] sm:$0xf0]  ;;  %v1544_v42 = vld [vmem:[%s1753_s13 + $0x74] sm:$0xf]  ;;  %v1299_v44 = vld [vmem:[%s1753_s13 + $0x78] sm:$0xf0] }
  0x17   : > { %v1298_v43 = vor.u32 %v1545_v41, %v1297_v40  ;;  %v1302_v45 = vor.u32 %v1544_v42, %v1299_v44  ;;  %v1265_v46 = vld [vmem:[%s1753_s13 + $0x30] sm:$0xf]  ;;  %v1537_v47 = vld [vmem:[%s1753_s13 + $0x34] sm:$0xf0]  ;;  %v1536_v48 = vld [vmem:[%s1753_s13 + $0x34] sm:$0xf] }
  0x18   : > { %504 = vmatpush.bf16.msra.mxu0 %v1550_v6  ;;  %1605 = vmatpush.bf16.msra.mxu3 %v1550_v6  ;;  %v1267_v49 = vld [vmem:[%s1753_s13 + $0x38] sm:$0xf0]  ;;  %v1266_v50 = vor.u32 %v1537_v47, %v1265_v46  ;;  %v1273_v52 = vld [vmem:[%s1753_s13 + $0x40] sm:$0xf]  ;;  %v1539_v53 = vld [vmem:[%s1753_s13 + $0x44] sm:$0xf0] }
  0x19   : > { %553 = vmatpush.bf16.msra.mxu1 %v1558_v7  ;;  %1613 = vmatpush.bf16.msra.mxu2 %v1558_v7  ;;  %v1270_v51 = vor.u32 %v1536_v48, %v1267_v49  ;;  %v1538_v54 = vld [vmem:[%s1753_s13 + $0x44] sm:$0xf]  ;;  %v1275_v55 = vld [vmem:[%s1753_s13 + $0x48] sm:$0xf0]  ;;  %v1274_v56 = vor.u32 %v1539_v53, %v1273_v52  ;;  %v1281_v58 = vld [vmem:[%s1753_s13 + $0x50] sm:$0xf] }
  0x1a   : > { %v1278_v57 = vor.u32 %v1538_v54, %v1275_v55  ;;  %v1541_v59 = vld [vmem:[%s1753_s13 + $0x54] sm:$0xf0]  ;;  %v1540_v60 = vld [vmem:[%s1753_s13 + $0x54] sm:$0xf]  ;;  %v1283_v61 = vld [vmem:[%s1753_s13 + $0x58] sm:$0xf0] }
  0x1b   : > { %v1282_v62 = vor.u32 %v1541_v59, %v1281_v58  ;;  %v1286_v63 = vor.u32 %v1540_v60, %v1283_v61  ;;  %v1645_v18 = vmov 0.0   ;;  %v1634_v32 = vld [vmem:[%s1980_s2] ss:$0 sm:$0xff] }
  0x1c   : > { %505 = vmatpush.bf16.msra.mxu0 %v1549_v8  ;;  %1606 = vmatpush.bf16.msra.mxu3 %v1549_v8  ;;  %627 = vst [vmem:[#allocation3] sm:$0xff] %v1645_v18 }
  0x1d   : > { %554 = vmatpush.bf16.msra.mxu1 %v1557_v9  ;;  %1614 = vmatpush.bf16.msra.mxu2 %v1557_v9  ;;  %630 = vst [vmem:[#allocation3 + $0x18] sm:$0xff] %v1645_v18 }
  0x1e   : > { %628 = vst [vmem:[#allocation3 + $0x8] sm:$0xff] %v1645_v18 }
  0x1f   : > { %629 = vst [vmem:[#allocation3 + $0x10] sm:$0xff] %v1645_v18 }
  0x20   : > { %506 = vmatpush.bf16.msra.mxu0 %v1548_v10  ;;  %1607 = vmatpush.bf16.msra.mxu3 %v1548_v10 }
  0x21   : > { %555 = vmatpush.bf16.msra.mxu1 %v1556_v11  ;;  %1615 = vmatpush.bf16.msra.mxu2 %v1556_v11 }
  0x24   : > { %507 = vmatpush.bf16.msra.mxu0 %v1547_v12  ;;  %1608 = vmatpush.bf16.msra.mxu3 %v1547_v12 }
  0x25   : > { %556 = vmatpush.bf16.msra.mxu1 %v1555_v13  ;;  %1616 = vmatpush.bf16.msra.mxu2 %v1555_v13 }
  0x28   : > { %508 = vmatpush.bf16.msra.mxu0 %v1546_v14  ;;  %1609 = vmatpush.bf16.msra.mxu3 %v1546_v14 }
  0x29   : > { %557 = vmatpush.bf16.msra.mxu1 %v1554_v15  ;;  %1617 = vmatpush.bf16.msra.mxu2 %v1554_v15 }
  0x2b   : > { %509 = vmatmul.bf16.vlgmr.msra.gmra.mxu0 %v1242_v20  ;;  %539 = vmatmul.bf16.vlgmr.msra.gmra.mxu3 %v1290_v31 }
  0x2c   : > { %558 = vmatmul.bf16.vlgmr.msra.gmra.mxu1 %v1246_v21  ;;  %588 = vmatmul.bf16.vlgmr.msra.gmra.mxu2 %v1294_v33 }
  0x3b   : > { %514 = vmatmul.bf16.gmra.mxu0 %v1250_v26  ;;  %544 = vmatmul.bf16.gmra.mxu3 %v1298_v43 }
  0x3c   : > { %563 = vmatmul.bf16.gmra.mxu1 %v1254_v27  ;;  %593 = vmatmul.bf16.gmra.mxu2 %v1302_v45 }
  0x4b   : > { %519 = vmatmul.bf16.gmra.mxu0 %v1258_v38 }
  0x4c   : > { %568 = vmatmul.bf16.gmra.mxu1 %v1262_v39 }
  0x5b   : > { %524 = vmatmul.bf16.gmra.mxu0 %v1266_v50 }
  0x5c   : > { %573 = vmatmul.bf16.gmra.mxu1 %v1270_v51 }
  0x6b   : > { %529 = vmatmul.bf16.gmra.mxu0 %v1274_v56 }
  0x6c   : > { %578 = vmatmul.bf16.gmra.mxu1 %v1278_v57 }
  0x7b   : > { %534 = vmatmul.bf16.gmra.mxu0 %v1282_v62 }
  0x7c   : > { %583 = vmatmul.bf16.gmra.mxu1 %v1286_v63 }
  0xa8   : > { %v510_v0 = vpop.f32.mrf.mxu0 }
  0xa9   : > { %v559_v1 = vpop.f32.mrf.mxu1 }
  0xaa   : > { %v560_v2 = vadd.f32 %v559_v1, %v510_v0 }
  0xae   : > { %v540_v19 = vpop.f32.mrf.mxu3 }
  0xaf   : > { %v589_v20 = vpop.f32.mrf.mxu2 }
  0xb0   : > { %v512_v3 = vpop.f32.mrf.mxu0  ;;  %v590_v24 = vadd.f32 %v589_v20, %v540_v19 }
  0xb1   : > { %v561_v4 = vpop.f32.mrf.mxu1 }
  0xb2   : > { %v562_v5 = vadd.f32 %v561_v4, %v512_v3 }
  0xb6   : > { %v542_v28 = vpop.f32.mrf.mxu3 }
  0xb7   : > { %v591_v29 = vpop.f32.mrf.mxu2 }
  0xb8   : > { %v515_v6 = vpop.f32.mrf.mxu0  ;;  %v592_v39 = vadd.f32 %v591_v29, %v542_v28 }
  0xb9   : > { %v564_v7 = vpop.f32.mrf.mxu1 }
  0xba   : > { %v1793_v8 = vadd.f32 %v564_v7, %v515_v6 }
  0xbe   : > { %v545_v41 = vpop.f32.mrf.mxu3 }
  0xbf   : > { %v594_v42 = vpop.f32.mrf.mxu2 }
  0xc0   : > { %v517_v9 = vpop.f32.mrf.mxu0  ;;  %v595_v48 = vadd.f32 %v594_v42, %v545_v41  ;;  %v1573_v41 = vld [vmem:[%s1981_s3 + $0x58] sm:$0xff] }
  0xc1   : > { %v566_v10 = vpop.f32.mrf.mxu1 }
  0xc2   : > { %v1795_v11 = vadd.f32 %v566_v10, %v517_v9 }
  0xc6   : > { %v547_v58 = vpop.f32.mrf.mxu3 }
  0xc7   : > { %v596_v59 = vpop.f32.mrf.mxu2 }
  0xc8   : > { %v520_v12 = vpop.f32.mrf.mxu0  ;;  %v597_v0 = vadd.f32 %v596_v59, %v547_v58  ;;  %v1583_v58 = vld [vmem:[%s1981_s3 + $0xa8] sm:$0xff] }
  0xc9   : > { %v569_v13 = vpop.f32.mrf.mxu1 }
  0xca   : > { %v570_v23 = vadd.f32 %v569_v13, %v520_v12 }
  0xcc   : > { %v599_v30 = vmax.f32 %v560_v2, %v570_v23 }
  0xd0   : > { %v522_v14 = vpop.f32.mrf.mxu0 }
  0xd1   : > { %v571_v15 = vpop.f32.mrf.mxu1 }
  0xd2   : > { %v572_v34 = vadd.f32 %v571_v15, %v522_v14 }
  0xd4   : > { %v600_v43 = vmax.f32 %v562_v5, %v572_v34  ;;  %v1576_v34 = vld [vmem:[%s1981_s3 + $0x70] sm:$0xff] }
  0xd8   : > { %v525_v16 = vpop.f32.mrf.mxu0 }
  0xd9   : > { %v574_v17 = vpop.f32.mrf.mxu1 }
  0xda   : > { %v575_v46 = vadd.f32 %v574_v17, %v525_v16 }
  0xdc   : > { %v601_v56 = vmax.f32 %v1793_v8, %v575_v46  ;;  %v1571_v46 = vld [vmem:[%s1981_s3 + $0x48] sm:$0xff] }
  0xe0   : > { %v527_v21 = vpop.f32.mrf.mxu0 }
  0xe1   : > { %v576_v22 = vpop.f32.mrf.mxu1 }
  0xe2   : > { %v577_v62 = vadd.f32 %v576_v22, %v527_v21 }
  0xe4   : > { %v602_v7 = vmax.f32 %v1795_v11, %v577_v62  ;;  %v1590_v62 = vld [vmem:[%s1981_s3 + $0xe0] sm:$0xff] }
  0xe8   : > { %v530_v25 = vpop.f32.mrf.mxu0 }
  0xe9   : > { %v579_v26 = vpop.f32.mrf.mxu1 }
  0xea   : > { %v580_v27 = vadd.f32 %v579_v26, %v530_v25 }
  0xec   : > { %v603_v31 = vmax.f32 %v580_v27, %v590_v24 }
  0xee   : > { %v607_v33 = vmax.f32 %v599_v30, %v603_v31  ;;  %v1569_v31 = vld [vmem:[%s1981_s3 + $0x38] sm:$0xff] }
  0xef   : > { %1041 = vmatpush.bf16.msrb.mxu2 %v1569_v31  ;;  %v1598_v31 = vld [vmem:[%s1983_s5 + $0x20] sm:$0xff] }
  0xf0   : > { %v615_v35 = vadd.f32 %v1634_v32, %v607_v33  ;;  %v532_v36 = vpop.f32.mrf.mxu0  ;;  %v1568_v33 = vld [vmem:[%s1981_s3 + $0x30] sm:$0xff] }
  0xf1   : > { %v581_v37 = vpop.f32.mrf.mxu1 }
  0xf2   : > { %v619_v38 = vmax.f32 %v615_v35, 0.0  ;;  %v582_v40 = vadd.f32 %v581_v37, %v532_v36  ;;  %v1567_v35 = vld [vmem:[%s1981_s3 + $0x28] sm:$0xff] }
  0xf3   : > { %1042 = vmatpush.bf16.msrb.mxu2 %v1568_v33  ;;  %v1575_v36 = vld [vmem:[%s1981_s3 + $0x68] sm:$0xff]  ;;  %v1596_v33 = vld [vmem:[%s1983_s5 + $0x10] sm:$0xff] }
  0xf4   : > { %623 = vst [vmem:[#allocation2] sm:$0xff] %v619_v38  ;;  %v604_v44 = vmax.f32 %v582_v40, %v592_v39  ;;  %v1566_v38 = vld [vmem:[%s1981_s3 + $0x20] sm:$0xff]  ;;  %v1565_v40 = vld [vmem:[%s1981_s3 + $0x18] sm:$0xff] }
  0xf5   : > { %v1574_v39 = vld [vmem:[%s1981_s3 + $0x60] sm:$0xff] }
  0xf6   : > { %v608_v45 = vmax.f32 %v600_v43, %v604_v44  ;;  %v1564_v43 = vld [vmem:[%s1981_s3 + $0x10] sm:$0xff] }
  0xf7   : > { %1043 = vmatpush.bf16.msrb.mxu2 %v1567_v35  ;;  %v1572_v44 = vld [vmem:[%s1981_s3 + $0x50] sm:$0xff]  ;;  %v1595_v35 = vld [vmem:[%s1983_s5 + $0x8] sm:$0xff] }
  0xf8   : > { %v616_v47 = vadd.f32 %v1634_v32, %v608_v45  ;;  %v535_v49 = vpop.f32.mrf.mxu0  ;;  %v1563_v45 = vld [vmem:[%s1981_s3 + $0x8] sm:$0xff] }
  0xf9   : > { %v584_v50 = vpop.f32.mrf.mxu1 }
  0xfa   : > { %v620_v51 = vmax.f32 %v616_v47, 0.0  ;;  %v585_v52 = vadd.f32 %v584_v50, %v535_v49  ;;  %v1570_v49 = vld [vmem:[%s1981_s3 + $0x40] sm:$0xff]  ;;  %v1593_v50 = vld [vmem:[%s1981_s3 + $0xf8] sm:$0xff] }
  0xfb   : > { %v655_v53 = vld [vmem:[#allocation2 + $0x4] sm:$0x1]  ;;  %v648_v54 = vld [vmem:[#allocation2 + $0x3] sm:$0x1]  ;;  %v634_v55 = vld [vmem:[#allocation2 + $0x1] sm:$0x1]  ;;  %1044 = vmatpush.bf16.msrb.mxu2 %v1566_v38 }
  0xfc   : > { %624 = vst [vmem:[#allocation2 + $0x8] sm:$0xff] %v620_v51  ;;  %v605_v57 = vmax.f32 %v585_v52, %v595_v48  ;;  %657 = vrot.lane.b32.xlu2 %v655_v53, %s1646_s20  ;;  %650 = vrot.lane.b32.xlu1 %v648_v54, %s1647_s21  ;;  %v631_v60 = vld [vmem:[#allocation2] sm:$0x1]  ;;  %v669_v5 = vld [vmem:[#allocation2 + $0x6] sm:$0x1]  ;;  %v1585_v51 = vld [vmem:[%s1981_s3 + $0xb8] sm:$0xff] }
  0xfd   : > { %636 = vrot.lane.b32.xlu0 %v634_v55, %s1648_s22  ;;  %633 = vst.msk [vmem:[#allocation3] sm:$0x1] %vm632_vm0, %v631_v60  ;;  %v676_v6 = vld [vmem:[#allocation2 + $0x7] sm:$0x1]  ;;  %v641_v9 = vld [vmem:[#allocation2 + $0x2] sm:$0x1] }
  0xfe   : > { %v609_v61 = vmax.f32 %v601_v56, %v605_v57  ;;  %v662_v16 = vld [vmem:[#allocation2 + $0x5] sm:$0x1]  ;;  %v1592_v55 = vld [vmem:[%s1981_s3 + $0xf0] sm:$0xff]  ;;  %v1591_v57 = vld [vmem:[%s1981_s3 + $0xe8] sm:$0xff] }
  0xff   : > { %1045 = vmatpush.bf16.msrb.mxu2 %v1565_v40  ;;  %v1562_v48 = vld [vmem:[%s1981_s3] sm:$0xff]  ;;  %v1584_v56 = vld [vmem:[%s1981_s3 + $0xb0] sm:$0xff] }
 0x100   : > { %v617_v63 = vadd.f32 %v1634_v32, %v609_v61  ;;  %v537_v1 = vpop.f32.mrf.mxu0  ;;  %v1635_v40 = vld [vmem:[%s1982_s4] ss:$0 sm:$0xff] }
 0x101   : > { %v586_v2 = vpop.f32.mrf.mxu1 }
 0x102   : > { %v621_v3 = vmax.f32 %v617_v63, 0.0  ;;  %v587_v4 = vadd.f32 %v586_v2, %v537_v1  ;;  %v1582_v63 = vld [vmem:[%s1981_s3 + $0xa0] sm:$0xff]  ;;  %v1581_v1 = vld [vmem:[%s1981_s3 + $0x98] sm:$0xff] }
 0x103   : > { %v683_v10 = vld [vmem:[#allocation2 + $0x8] sm:$0x1]  ;;  %v691_v15 = vld [vmem:[#allocation2 + $0xa] sm:$0x1]  ;;  %v685_v11 = vld [vmem:[#allocation2 + $0x9] sm:$0x1]  ;;  %1046 = vmatpush.bf16.msrb.mxu2 %v1564_v43 }
 0x104   : > { %625 = vst [vmem:[#allocation2 + $0x10] sm:$0xff] %v621_v3  ;;  %v606_v8 = vmax.f32 %v587_v4, %v597_v0  ;;  %671 = vrot.lane.b32.xlu2 %v669_v5, %s1649_s23  ;;  %678 = vrot.lane.b32.xlu1 %v676_v6, %s1650_s26  ;;  %v709_v18 = vld [vmem:[#allocation2 + $0xd] sm:$0x1]  ;;  %v697_v19 = vld [vmem:[#allocation2 + $0xb] sm:$0x1]  ;;  %v1589_v0 = vld [vmem:[%s1981_s3 + $0xd8] sm:$0xff] }
 0x105   : > { %643 = vrot.lane.b32.xlu0 %v641_v9, %s1651_s27  ;;  %684 = vst.msk [vmem:[#allocation3 + $0x8] sm:$0x1] %vm632_vm0, %v683_v10  ;;  %v703_v21 = vld [vmem:[#allocation2 + $0xc] sm:$0x1]  ;;  %v721_v23 = vld [vmem:[#allocation2 + $0xf] sm:$0x1] }
 0x106   : > { %v610_v12 = vmax.f32 %v602_v7, %v606_v8  ;;  %v715_v24 = vld [vmem:[#allocation2 + $0xe] sm:$0x1]  ;;  %v1588_v4 = vld [vmem:[%s1981_s3 + $0xd0] sm:$0xff]  ;;  %v1586_v8 = vld [vmem:[%s1981_s3 + $0xc0] sm:$0xff] }
 0x107   : > { %1047 = vmatpush.bf16.msrb.mxu2 %v1563_v45  ;;  %v1580_v5 = vld [vmem:[%s1981_s3 + $0x90] sm:$0xff]  ;;  %v1587_v6 = vld [vmem:[%s1981_s3 + $0xc8] sm:$0xff]  ;;  %v1578_v10 = vld [vmem:[%s1981_s3 + $0x80] sm:$0xff] }
 0x108   : > { %v618_v13 = vadd.f32 %v1634_v32, %v610_v12  ;;  %v1577_v32 = vld [vmem:[%s1981_s3 + $0x78] sm:$0xff]  ;;  %v1579_v7 = vld [vmem:[%s1981_s3 + $0x88] sm:$0xff] }
 0x109   : > { %1054 = vmatpush.bf16.msrb.mxu3 %v1577_v32  ;;  %v1597_v32 = vld [vmem:[%s1983_s5 + $0x18] sm:$0xff] }
 0x10a   : > { %v622_v14 = vmax.f32 %v618_v13, 0.0 }
 0x10b   : > { %v727_v17 = vld [vmem:[#allocation2 + $0x10] sm:$0x1]  ;;  %v729_v22 = vld [vmem:[#allocation2 + $0x11] sm:$0x1]  ;;  %v747_v25 = vld [vmem:[#allocation2 + $0x14] sm:$0x1]  ;;  %1048 = vmatpush.bf16.msrb.mxu2 %v1562_v48 }
 0x10c   : > { %626 = vst [vmem:[#allocation2 + $0x18] sm:$0xff] %v622_v14  ;;  %693 = vrot.lane.b32.xlu2 %v691_v15, %s1651_s27  ;;  %687 = vrot.lane.b32.xlu1 %v685_v11, %s1648_s22  ;;  %v741_v26 = vld [vmem:[#allocation2 + $0x13] sm:$0x1]  ;;  %v735_v27 = vld [vmem:[#allocation2 + $0x12] sm:$0x1] }
 0x10d   : > { %664 = vrot.lane.b32.xlu0 %v662_v16, %s1652_s28  ;;  %728 = vst.msk [vmem:[#allocation3 + $0x10] sm:$0x1] %vm632_vm0, %v727_v17  ;;  %v765_v28 = vld [vmem:[#allocation2 + $0x17] sm:$0x1]  ;;  %v759_v29 = vld [vmem:[#allocation2 + $0x16] sm:$0x1]  ;;  %1055 = vmatpush.bf16.msrb.mxu3 %v1576_v34 }
 0x10e   : > { %v753_v30 = vld [vmem:[#allocation2 + $0x15] sm:$0x1] }
 0x10f   : > { %1067 = vmatpush.bf16.msra.mxu2 %v1585_v51  ;;  %v1636_v51 = vld [vmem:[%s1984_s6] ss:$0 sm:$0xff] }
 0x111   : > { %1056 = vmatpush.bf16.msrb.mxu3 %v1575_v36  ;;  %v1594_v36 = vld [vmem:[%s1983_s5] sm:$0xff] }
 0x113   : > { %v771_v20 = vld [vmem:[#allocation2 + $0x18] sm:$0x1]  ;;  %1068 = vmatpush.bf16.msra.mxu2 %v1584_v56 }
 0x114   : > { %711 = vrot.lane.b32.xlu2 %v709_v18, %s1652_s28  ;;  %699 = vrot.lane.b32.xlu1 %v697_v19, %s1647_s21  ;;  %772 = vst.msk [vmem:[#allocation3 + $0x18] sm:$0x1] %vm632_vm0, %v771_v20 }
 0x115   : > { %705 = vrot.lane.b32.xlu0 %v703_v21, %s1646_s20  ;;  %1057 = vmatpush.bf16.msrb.mxu3 %v1574_v39 }
 0x117   : > { %1069 = vmatpush.bf16.msra.mxu2 %v1583_v58 }
 0x119   : > { %1058 = vmatpush.bf16.msrb.mxu3 %v1573_v41 }
 0x11b   : > { %1070 = vmatpush.bf16.msra.mxu2 %v1582_v63 }
 0x11c   : > { %731 = vrot.lane.b32.xlu2 %v729_v22, %s1648_s22  ;;  %723 = vrot.lane.b32.xlu1 %v721_v23, %s1650_s26 }
 0x11d   : > { %717 = vrot.lane.b32.xlu0 %v715_v24, %s1649_s23  ;;  %1059 = vmatpush.bf16.msrb.mxu3 %v1572_v44  ;;  %v776_v24 = vld [vmem:[#allocation3 + $0x18] sm:$0xff] }
 0x11f   : > { %1071 = vmatpush.bf16.msra.mxu2 %v1581_v1 }
 0x121   : > { %1060 = vmatpush.bf16.msrb.mxu3 %v1571_v46 }
 0x123   : > { %1072 = vmatpush.bf16.msra.mxu2 %v1580_v5 }
 0x124   : > { %749 = vrot.lane.b32.xlu2 %v747_v25, %s1646_s20  ;;  %743 = vrot.lane.b32.xlu1 %v741_v26, %s1647_s21  ;;  %v780_v25 = vpack.c.bf16 %v776_v24, %v776_v24 }
 0x125   : > { %737 = vrot.lane.b32.xlu0 %v735_v27, %s1651_s27  ;;  %1061 = vmatpush.bf16.msrb.mxu3 %v1570_v49 }
 0x127   : > { %1073 = vmatpush.bf16.msra.mxu2 %v1579_v7 }
 0x129   : > { %1080 = vmatpush.bf16.msra.mxu3 %v1593_v50 }
 0x12b   : > { %1074 = vmatpush.bf16.msra.mxu2 %v1578_v10 }
 0x12c   : > { %767 = vrot.lane.b32.xlu2 %v765_v28, %s1650_s26  ;;  %761 = vrot.lane.b32.xlu1 %v759_v29, %s1649_s23  ;;  %v1601_v28 = vld [vmem:[%s1983_s5 + $0x38] sm:$0xff]  ;;  %v1600_v29 = vld [vmem:[%s1983_s5 + $0x30] sm:$0xff] }
 0x12d   : > { %755 = vrot.lane.b32.xlu0 %v753_v30, %s1652_s28  ;;  %1081 = vmatpush.bf16.msra.mxu3 %v1592_v55  ;;  %v1599_v30 = vld [vmem:[%s1983_s5 + $0x28] sm:$0xff] }
 0x131   : > { %1082 = vmatpush.bf16.msra.mxu3 %v1591_v57 }
 0x135   : > { %1083 = vmatpush.bf16.msra.mxu3 %v1590_v62 }
 0x139   : > { %1084 = vmatpush.bf16.msra.mxu3 %v1589_v0 }
 0x13d   : > { %1085 = vmatpush.bf16.msra.mxu3 %v1588_v4 }
 0x141   : > { %1086 = vmatpush.bf16.msra.mxu3 %v1587_v6 }
 0x145   : > { %1087 = vmatpush.bf16.msra.mxu3 %v1586_v8 }
 0x156   : > { %v658_v37 = vpop.permute.xlu2 %657 }
 0x15e   : > { %v672_v42 = vpop.permute.xlu2 %671 }
 0x166   : > { %v694_v47 = vpop.permute.xlu2 %693 }
 0x16e   : > { %v712_v52 = vpop.permute.xlu2 %711  ;;  %v651_v53 = vpop.permute.xlu1 %650 }
 0x16f   : > { %v637_v54 = vpop.permute.xlu0 %636 }
 0x170   : > { %640 = vst.msk [vmem:[#allocation3] sm:$0x1] %vm639_vm1, %v637_v54 }
 0x176   : > { %v732_v59 = vpop.permute.xlu2 %731  ;;  %v679_v60 = vpop.permute.xlu1 %678 }
 0x177   : > { %734 = vst.msk [vmem:[#allocation3 + $0x10] sm:$0x1] %vm639_vm1, %v732_v59  ;;  %v644_v61 = vpop.permute.xlu0 %643 }
 0x178   : > { %647 = vst.msk [vmem:[#allocation3] sm:$0x1] %vm646_vm2, %v644_v61 }
 0x179   : > { %654 = vst.msk [vmem:[#allocation3] sm:$0x1] %vm653_vm3, %v651_v53 }
 0x17a   : > { %661 = vst.msk [vmem:[#allocation3] sm:$0x1] %vm660_vm4, %v658_v37 }
 0x17e   : > { %v688_v2 = vpop.permute.xlu1 %687  ;;  %v750_v17 = vpop.permute.xlu2 %749 }
 0x17f   : > { %690 = vst.msk [vmem:[#allocation3 + $0x8] sm:$0x1] %vm639_vm1, %v688_v2  ;;  %v665_v3 = vpop.permute.xlu0 %664 }
 0x180   : > { %696 = vst.msk [vmem:[#allocation3 + $0x8] sm:$0x1] %vm646_vm2, %v694_v47 }
 0x181   : > { %668 = vst.msk [vmem:[#allocation3] sm:$0x1] %vm667_vm5, %v665_v3 }
 0x182   : > { %675 = vst.msk [vmem:[#allocation3] sm:$0x1] %vm674_vm6, %v672_v42 }
 0x183   : > { %682 = vst.msk [vmem:[#allocation3] sm:$0x1] %vm681_vm7, %v679_v60 }
 0x186   : > { %v700_v9 = vpop.permute.xlu1 %699  ;;  %v768_v23 = vpop.permute.xlu2 %767 }
 0x187   : > { %702 = vst.msk [vmem:[#allocation3 + $0x8] sm:$0x1] %vm653_vm3, %v700_v9  ;;  %v706_v12 = vpop.permute.xlu0 %705 }
 0x188   : > { %708 = vst.msk [vmem:[#allocation3 + $0x8] sm:$0x1] %vm660_vm4, %v706_v12 }
 0x189   : > { %714 = vst.msk [vmem:[#allocation3 + $0x8] sm:$0x1] %vm667_vm5, %v712_v52 }
 0x18a   : > { %v773_v13 = vld [vmem:[#allocation3] sm:$0xff] }
 0x18b   : > { %v777_v14 = vpack.c.bf16 %v773_v13, %v773_v13 }
 0x18d   : > { %1049 = vmatmul.bf16.vlgmr.msrb.gmra.mxu2 %v777_v14 }
 0x18e   : > { %v724_v15 = vpop.permute.xlu1 %723  ;;  %1163 = vmatpush.bf16.msrb.mxu2 %v1601_v28 }
 0x18f   : > { %v718_v11 = vpop.permute.xlu0 %717 }
 0x190   : > { %720 = vst.msk [vmem:[#allocation3 + $0x8] sm:$0x1] %vm674_vm6, %v718_v11 }
 0x191   : > { %726 = vst.msk [vmem:[#allocation3 + $0x8] sm:$0x1] %vm681_vm7, %v724_v15 }
 0x192   : > { %1164 = vmatpush.bf16.msrb.mxu2 %v1600_v29 }
 0x196   : > { %v744_v16 = vpop.permute.xlu1 %743  ;;  %1165 = vmatpush.bf16.msrb.mxu2 %v1599_v30 }
 0x197   : > { %v738_v18 = vpop.permute.xlu0 %737 }
 0x198   : > { %740 = vst.msk [vmem:[#allocation3 + $0x10] sm:$0x1] %vm646_vm2, %v738_v18  ;;  %v774_v19 = vld [vmem:[#allocation3 + $0x8] sm:$0xff] }
 0x199   : > { %746 = vst.msk [vmem:[#allocation3 + $0x10] sm:$0x1] %vm653_vm3, %v744_v16  ;;  %v778_v20 = vpack.c.bf16 %v774_v19, %v774_v19 }
 0x19a   : > { %752 = vst.msk [vmem:[#allocation3 + $0x10] sm:$0x1] %vm660_vm4, %v750_v17  ;;  %1166 = vmatpush.bf16.msrb.mxu2 %v1598_v31 }
 0x19b   : > { %1062 = vmatmul.bf16.vlgmr.msrb.gmra.mxu3 %v778_v20 }
 0x19e   : > { %v762_v21 = vpop.permute.xlu1 %761  ;;  %1167 = vmatpush.bf16.msrb.mxu2 %v1597_v32 }
 0x19f   : > { %v756_v22 = vpop.permute.xlu0 %755 }
 0x1a0   : > { %758 = vst.msk [vmem:[#allocation3 + $0x10] sm:$0x1] %vm667_vm5, %v756_v22 }
 0x1a1   : > { %764 = vst.msk [vmem:[#allocation3 + $0x10] sm:$0x1] %vm674_vm6, %v762_v21 }
 0x1a2   : > { %770 = vst.msk [vmem:[#allocation3 + $0x10] sm:$0x1] %vm681_vm7, %v768_v23  ;;  %1168 = vmatpush.bf16.msrb.mxu2 %v1596_v33 }
 0x1a6   : > { %1169 = vmatpush.bf16.msrb.mxu2 %v1595_v35 }
 0x1a9   : > { %v775_v26 = vld [vmem:[#allocation3 + $0x10] sm:$0xff] }
 0x1aa   : > { %v779_v27 = vpack.c.bf16 %v775_v26, %v775_v26  ;;  %1170 = vmatpush.bf16.msrb.mxu2 %v1594_v36 }
 0x1ab   : > { %1088 = vmatmul.bf16.vlgmr.msra.gmra.mxu3 %v780_v25 }
 0x1ac   : > { %1075 = vmatmul.bf16.vlgmr.msra.gmra.mxu2 %v779_v27 }
 0x210   : > { %v1050_v34 = vpop.f32.mrf.mxu2 }
 0x211   : > { %v1051_v41 = vadd.f32 %v1635_v40, %v1050_v34 }
 0x218   : > { %v1052_v37 = vpop.f32.mrf.mxu2 }
 0x21e   : > { %v1063_v38 = vpop.f32.mrf.mxu3 }
 0x21f   : > { %v1064_v42 = vadd.f32 %v1063_v38, %v1051_v41 }
 0x226   : > { %v1065_v39 = vpop.f32.mrf.mxu3 }
 0x22e   : > { %v1089_v43 = vpop.f32.mrf.mxu3 }
 0x22f   : > { %v1076_v44 = vpop.f32.mrf.mxu2 }
 0x230   : > { %v1077_v45 = vadd.f32 %v1076_v44, %v1064_v42 }
 0x232   : > { %v1090_v46 = vadd.f32 %v1089_v43, %v1077_v45 }
 0x234   : > { %v1093_v47 = vmax.f32 %v1090_v46, 0.0 }
 0x236   : > { %v1094_v48 = vpack.c.bf16 %v1093_v47, %v1093_v47  ;;  %v1091_v49 = vpop.f32.mrf.mxu3 }
 0x237   : > { %v1078_v50 = vpop.f32.mrf.mxu2 }
 0x238   : > { %1171 = vmatmul.bf16.vlgmr.msrb.gmra.mxu2 %v1094_v48 }
 0x2bb   : > { %v1172_v52 = vpop.f32.mrf.mxu2 }
 0x2bc   : > { %v1173_v53 = vadd.f32 %v1636_v51, %v1172_v52 }
 0x2be   : > { %v1176_v54 = vmax.f32 %v1173_v53, 0.0 }
 0x2c0   : > { %1177 = vst [vmem:[%s276_s9] sm:$0xff] %v1176_v54 }
 0x2c3   : > { %v1174_v55 = vpop.f32.mrf.mxu2 }
 0x2c4 PF: > { %s17_s24 = sadd.s32 1, %s1643_s24  }
 0x2c5   : > { %p14_p4 = scmp.ge.s32.totalorder %s17_s24, 4  }
 0x2c7   :  { %16 = sbr.rel (!%p14_p4) target bundleno = 1 (0x1), region = 78 }

</bundles_post_ra>
